<compile_context>
chip_gen: v7x
topology: tpu7x:2x2x1
jax: 0.10.0
libtpu: 0.0.40
codegen_flags: <defaults>
</compile_context>

<pallas_src>
import math

import jax
import jax.numpy as jnp
from jax.experimental import pallas as pl
from jax.experimental.pallas import tpu as pltpu


def _round_up(a, b):
    return (a + b - 1) // b * b


# ---------------------------------------------------------------------------
# Kernel: three batched matmuls (folded conv+fc1, fc2, out head).
# ---------------------------------------------------------------------------
def _net_kernel(x_ref, w1_ref, b1_ref, w2_ref, b2_ref, w3_ref, b3_ref, o_ref):
    x = x_ref[...]                                            # (BT, Kp) f32

    # fc1  (== conv1 -> conv2 -> flatten -> fc1, folded into one affine map)
    y1 = jnp.dot(x.astype(jnp.bfloat16), w1_ref[...],
                 preferred_element_type=jnp.float32) + b1_ref[...]
    y1 = jnp.maximum(y1, 0.0)

    # fc2 + relu
    y2 = jnp.dot(y1.astype(jnp.bfloat16), w2_ref[...],
                 preferred_element_type=jnp.float32) + b2_ref[...]
    y2 = jnp.maximum(y2, 0.0)

    # output head (lane-padded to a multiple of 128)
    o_ref[...] = jnp.dot(y2.astype(jnp.bfloat16), w3_ref[...],
                         preferred_element_type=jnp.float32) + b3_ref[...]


# ---------------------------------------------------------------------------
# Wrapper-side parameter fold / padding (done once, batch-independent).
# ---------------------------------------------------------------------------
def _conv_stack(x2d, w1, w2):
    """conv1(3x3 valid) -> conv2(3x3 valid), no biases; x2d: (m, m)."""
    m = x2d.shape[0]
    h1 = jnp.zeros((m - 2, m - 2), x2d.dtype)
    for ki in range(3):
        for kj in range(3):
            h1 = h1 + x2d[ki:ki + m - 2, kj:kj + m - 2] * w1[ki, kj]
    h2 = jnp.zeros((m - 4, m - 4), x2d.dtype)
    for ki in range(3):
        for kj in range(3):
            h2 = h2 + h1[ki:ki + m - 4, kj:kj + m - 4] * w2[ki, kj]
    return h2


def _fold_conv_fc1(params, m):
    """Exactly fold conv1 -> conv2 -> flatten -> fc1 into (W_eff, b_eff)."""
    w1, b1 = params["conv1_w"], params["conv1_b"]
    w2, b2 = params["conv2_w"], params["conv2_b"]
    f = m - 4
    # Linear part: response of the (bias-free) conv stack to each basis pixel.
    eye = jnp.eye(m * m, dtype=jnp.float32).reshape(m * m, m, m)
    C = jax.vmap(lambda e: _conv_stack(e, w1, w2).reshape(f * f))(eye)  # (m*m, f*f)
    # Bias part: a constant b1 image through conv2 gives b1*sum(w2) + b2.
    bias_flat = jnp.full((1, f * f), b1[0] * jnp.sum(w2) + b2[0], jnp.float32)
    w_eff = C @ params["fc1_w"]                                 # (m*m, 1024)
    b_eff = bias_flat @ params["fc1_w"] + params["fc1_b"]       # (1, 1024)
    return w_eff, b_eff


def net_forward(x_nchw, params, *, bt_max=256):
    """x_nchw: (B, 1, m, m) float32.  Returns (B, n) action values."""
    B, _, m, _ = x_nchw.shape
    n = params["out_w"].shape[1]

    # Fold the affine conv front-end into fc1 (exact).
    w_eff, b_eff = _fold_conv_fc1(params, m)

    # Lane / batch padding.
    k = m * m
    k_pad = _round_up(k, 128)                  # lane-dense contraction dim
    n_pad = _round_up(n, 128)                  # lane-dense output (no vst.msk)
    # Batch tile: multiple of 8 sublanes, up to 256 (MXU rows on v6e/v7x;
    # on v5e a 256-row tile is simply two 128-row MXU passes).
    bt = bt_max if B >= bt_max else _round_up(max(B, 1), 8)
    b_pad = _round_up(B, bt)

    x_flat = x_nchw[:, 0].reshape(B, k).astype(jnp.float32)
    x_p = jnp.zeros((b_pad, k_pad), jnp.float32).at[:B, :k].set(x_flat)

    w1 = jnp.zeros((k_pad, 1024), jnp.float32).at[:k, :].set(w_eff)
    w1 = w1.astype(jnp.bfloat16)
    b1 = b_eff                                                  # (1, 1024) f32
    w2 = params["fc2_w"].astype(jnp.bfloat16)                   # (1024, 512)
    b2 = params["fc2_b"]                                        # (1, 512)
    w3 = jnp.zeros((512, n_pad), jnp.float32).at[:, :n].set(params["out_w"])
    w3 = w3.astype(jnp.bfloat16)
    b3 = jnp.zeros((1, n_pad), jnp.float32).at[:, :n].set(params["out_b"])

    in_specs = [
        pl.BlockSpec((bt, k_pad), lambda b: (b, 0)),            # x tile
        pl.BlockSpec((k_pad, 1024), lambda b: (0, 0)),          # W_eff (bf16)
        pl.BlockSpec((1, 1024), lambda b: (0, 0)),              # b_eff
        pl.BlockSpec((1024, 512), lambda b: (0, 0)),            # fc2_w (bf16)
        pl.BlockSpec((1, 512), lambda b: (0, 0)),               # fc2_b
        pl.BlockSpec((512, n_pad), lambda b: (0, 0)),           # out_w (bf16)
        pl.BlockSpec((1, n_pad), lambda b: (0, 0)),             # out_b
    ]

    out = pl.pallas_call(
        _net_kernel,
        out_shape=jax.ShapeDtypeStruct((b_pad, n_pad), jnp.float32),
        grid=(b_pad // bt,),
        in_specs=in_specs,
        out_specs=pl.BlockSpec((bt, n_pad), lambda b: (b, 0)),
        compiler_params=pltpu.CompilerParams(
            dimension_semantics=("parallel",)),                 # v7x: 2 TCs
    )(x_p, w1, b1, w2, b2, w3, b3)

    return out[:B, :n]


# ---------------------------------------------------------------------------
# Synthetic params + pure-JAX f32 reference of the PyTorch forward.
# ---------------------------------------------------------------------------
def init_params(key, n):
    """Deterministic synthetic parameters matching Net(n)'s shapes."""
    m = int(math.sqrt(n) + 1)
    f = (m - 4) * (m - 4)
    ks = jax.random.split(key, 10)
    return {
        "conv1_w": 0.1 * jax.random.normal(ks[0], (3, 3), jnp.float32),
        "conv1_b": 0.1 * jax.random.normal(ks[1], (1,), jnp.float32),
        "conv2_w": 0.1 * jax.random.normal(ks[2], (3, 3), jnp.float32),
        "conv2_b": 0.1 * jax.random.normal(ks[3], (1,), jnp.float32),
        # Linear weights stored as (in, out) == PyTorch weight.T
        "fc1_w": 0.1 * jax.random.normal(ks[4], (f, 1024), jnp.float32),
        "fc1_b": 0.1 * jax.random.normal(ks[5], (1, 1024), jnp.float32),
        "fc2_w": 0.1 * jax.random.normal(ks[6], (1024, 512), jnp.float32),
        "fc2_b": 0.1 * jax.random.normal(ks[7], (1, 512), jnp.float32),
        "out_w": 0.1 * jax.random.normal(ks[8], (512, n), jnp.float32),
        "out_b": 0.1 * jax.random.normal(ks[9], (1, n), jnp.float32),
    }


def ref_forward(x_nchw, params):
    """Pure-JAX f32 reference of the PyTorch forward (for validation)."""
    B, _, m, _ = x_nchw.shape
    xs = x_nchw[:, 0]
    h1 = jnp.zeros((B, m - 2, m - 2), jnp.float32)
    for ki in range(3):
        for kj in range(3):
            h1 = h1 + xs[:, ki:ki + m - 2, kj:kj + m - 2] * params["conv1_w"][ki, kj]
    h1 = h1 + params["conv1_b"][0]
    h2 = jnp.zeros((B, m - 4, m - 4), jnp.float32)
    for ki in range(3):
        for kj in range(3):
            h2 = h2 + h1[:, ki:ki + m - 4, kj:kj + m - 4] * params["conv2_w"][ki, kj]
    h2 = h2 + params["conv2_b"][0]
    feat = h2.reshape(B, -1)                       # matches torch .view(-1, f*f)
    y1 = jnp.maximum(feat @ params["fc1_w"] + params["fc1_b"], 0.0)
    y2 = jnp.maximum(y1 @ params["fc2_w"] + params["fc2_b"], 0.0)
    return y2 @ params["out_w"] + params["out_b"]


if __name__ == "__main__":
    n = 64                                   # N_ACTIONS == N_STATES == 64
    m = int(math.sqrt(n) + 1)                # 9 -> input spatial 9x9
    B = 2

    key = jax.random.PRNGKey(0)
    kx, kp = jax.random.split(key)
    x = jax.random.normal(kx, (B, 1, m, m), jnp.float32)   # NCHW, C=1
    params = init_params(kp, n)

    out = net_forward(x, params)
    out = jax.block_until_ready(out)

    ref = ref_forward(x, params)
    assert out.shape == (B, n), out.shape
    # Tolerance widened slightly vs pure-f32 (bf16 weights on the MXU path,
    # f32 accumulation); typical max-abs error is a few e-3.
    assert jnp.allclose(out, ref, rtol=2e-2, atol=2e-2), float(
        jnp.max(jnp.abs(out - ref)))

    print("KERNEL_OK")
</pallas_src>

<mosaic_0001>
module attributes {stable_mosaic.version = 11 : i64} {
  func.func @_net_kernel(%arg0: i32, %arg1: memref<8x128xf32, #tpu.memory_space<vmem>>, %arg2: memref<128x1024xbf16, #tpu.memory_space<vmem>>, %arg3: memref<1x1024xf32, #tpu.memory_space<vmem>>, %arg4: memref<1024x512xbf16, #tpu.memory_space<vmem>>, %arg5: memref<1x512xf32, #tpu.memory_space<vmem>>, %arg6: memref<512x128xbf16, #tpu.memory_space<vmem>>, %arg7: memref<1x128xf32, #tpu.memory_space<vmem>>, %arg8: memref<8x128xf32, #tpu.memory_space<vmem>>) attributes {dimension_semantics = [#tpu.dimension_semantics<parallel>], iteration_bounds = array<i64: 1>, scalar_prefetch = 0 : i64, scratch_operands = 0 : i64, tpu.core_type = #tpu.core_type<tc>, window_params = [{transform_indices = @transform_0, window_bounds = array<i64: 8, 128>}, {pipeline_mode = #tpu.pipeline_mode<synchronous>, transform_indices = @transform_1, window_bounds = array<i64: 128, 1024>}, {pipeline_mode = #tpu.pipeline_mode<synchronous>, transform_indices = @transform_2, window_bounds = array<i64: 1, 1024>}, {pipeline_mode = #tpu.pipeline_mode<synchronous>, transform_indices = @transform_3, window_bounds = array<i64: 1024, 512>}, {pipeline_mode = #tpu.pipeline_mode<synchronous>, transform_indices = @transform_4, window_bounds = array<i64: 1, 512>}, {pipeline_mode = #tpu.pipeline_mode<synchronous>, transform_indices = @transform_5, window_bounds = array<i64: 512, 128>}, {pipeline_mode = #tpu.pipeline_mode<synchronous>, transform_indices = @transform_6, window_bounds = array<i64: 1, 128>}, {transform_indices = @transform_7, window_bounds = array<i64: 8, 128>}]} {
    %c0 = arith.constant 0 : index
    %c0_0 = arith.constant 0 : index
    %0 = vector.load %arg1[%c0, %c0_0] : memref<8x128xf32, #tpu.memory_space<vmem>>, vector<8x128xf32>
    %1 = arith.truncf %0 : vector<8x128xf32> to vector<8x128xbf16>
    %c0_1 = arith.constant 0 : index
    %c0_2 = arith.constant 0 : index
    %2 = vector.load %arg2[%c0_1, %c0_2] : memref<128x1024xbf16, #tpu.memory_space<vmem>>, vector<128x1024xbf16>
    %cst = arith.constant dense<0.000000e+00> : vector<8x1024xf32>
    %3 = tpu.matmul %1, %2, %cst {dimension_numbers = #tpu.dot_dimension_numbers<[1], [0], [0], [1], [0, 0, 1, 1], [], []>} : vector<8x128xbf16>, vector<128x1024xbf16>, vector<8x1024xf32> -> vector<8x1024xf32>
    %c0_3 = arith.constant 0 : index
    %c0_4 = arith.constant 0 : index
    %4 = vector.load %arg3[%c0_3, %c0_4] : memref<1x1024xf32, #tpu.memory_space<vmem>>, vector<1x1024xf32>
    %5 = vector.broadcast %4 : vector<1x1024xf32> to vector<8x1024xf32>
    %6 = arith.addf %3, %5 : vector<8x1024xf32>
    %cst_5 = arith.constant 0.000000e+00 : f32
    %7 = vector.broadcast %cst_5 : f32 to vector<8x1024xf32>
    %8 = arith.maximumf %6, %7 : vector<8x1024xf32>
    %9 = arith.truncf %8 : vector<8x1024xf32> to vector<8x1024xbf16>
    %c0_6 = arith.constant 0 : index
    %c0_7 = arith.constant 0 : index
    %10 = vector.load %arg4[%c0_6, %c0_7] : memref<1024x512xbf16, #tpu.memory_space<vmem>>, vector<1024x512xbf16>
    %cst_8 = arith.constant dense<0.000000e+00> : vector<8x512xf32>
    %11 = tpu.matmul %9, %10, %cst_8 {dimension_numbers = #tpu.dot_dimension_numbers<[1], [0], [0], [1], [0, 0, 1, 1], [], []>} : vector<8x1024xbf16>, vector<1024x512xbf16>, vector<8x512xf32> -> vector<8x512xf32>
    %c0_9 = arith.constant 0 : index
    %c0_10 = arith.constant 0 : index
    %12 = vector.load %arg5[%c0_9, %c0_10] : memref<1x512xf32, #tpu.memory_space<vmem>>, vector<1x512xf32>
    %13 = vector.broadcast %12 : vector<1x512xf32> to vector<8x512xf32>
    %14 = arith.addf %11, %13 : vector<8x512xf32>
    %cst_11 = arith.constant 0.000000e+00 : f32
    %15 = vector.broadcast %cst_11 : f32 to vector<8x512xf32>
    %16 = arith.maximumf %14, %15 : vector<8x512xf32>
    %17 = arith.truncf %16 : vector<8x512xf32> to vector<8x512xbf16>
    %c0_12 = arith.constant 0 : index
    %c0_13 = arith.constant 0 : index
    %18 = vector.load %arg6[%c0_12, %c0_13] : memref<512x128xbf16, #tpu.memory_space<vmem>>, vector<512x128xbf16>
    %cst_14 = arith.constant dense<0.000000e+00> : vector<8x128xf32>
    %19 = tpu.matmul %17, %18, %cst_14 {dimension_numbers = #tpu.dot_dimension_numbers<[1], [0], [0], [1], [0, 0, 1, 1], [], []>} : vector<8x512xbf16>, vector<512x128xbf16>, vector<8x128xf32> -> vector<8x128xf32>
    %c0_15 = arith.constant 0 : index
    %c0_16 = arith.constant 0 : index
    %20 = vector.load %arg7[%c0_15, %c0_16] : memref<1x128xf32, #tpu.memory_space<vmem>>, vector<1x128xf32>
    %21 = vector.broadcast %20 : vector<1x128xf32> to vector<8x128xf32>
    %22 = arith.addf %19, %21 : vector<8x128xf32>
    %c0_17 = arith.constant 0 : index
    %c0_18 = arith.constant 0 : index
    %23 = vector.load %arg8[%c0_17, %c0_18] : memref<8x128xf32, #tpu.memory_space<vmem>>, vector<8x128xf32>
    tpu.vector_store %arg8[%c0_17, %c0_18], %22 {strides = array<i32>} : memref<8x128xf32, #tpu.memory_space<vmem>>, vector<8x128xf32>,
    return
  }
  func.func @transform_0(%arg0: i32) -> (i32, i32) {
    %c0_i32 = arith.constant 0 : i32
    %c0_i32_0 = arith.constant 0 : i32
    return %arg0, %c0_i32 : i32, i32
  }
  func.func @transform_1(%arg0: i32) -> (i32, i32) {
    %c0_i32 = arith.constant 0 : i32
    %c0_i32_0 = arith.constant 0 : i32
    %c0_i32_1 = arith.constant 0 : i32
    return %c0_i32, %c0_i32_0 : i32, i32
  }
  func.func @transform_2(%arg0: i32) -> (i32, i32) {
    %c0_i32 = arith.constant 0 : i32
    %c0_i32_0 = arith.constant 0 : i32
    %c0_i32_1 = arith.constant 0 : i32
    return %c0_i32, %c0_i32_0 : i32, i32
  }
  func.func @transform_3(%arg0: i32) -> (i32, i32) {
    %c0_i32 = arith.constant 0 : i32
    %c0_i32_0 = arith.constant 0 : i32
    %c0_i32_1 = arith.constant 0 : i32
    return %c0_i32, %c0_i32_0 : i32, i32
  }
  func.func @transform_4(%arg0: i32) -> (i32, i32) {
    %c0_i32 = arith.constant 0 : i32
    %c0_i32_0 = arith.constant 0 : i32
    %c0_i32_1 = arith.constant 0 : i32
    return %c0_i32, %c0_i32_0 : i32, i32
  }
  func.func @transform_5(%arg0: i32) -> (i32, i32) {
    %c0_i32 = arith.constant 0 : i32
    %c0_i32_0 = arith.constant 0 : i32
    %c0_i32_1 = arith.constant 0 : i32
    return %c0_i32, %c0_i32_0 : i32, i32
  }
  func.func @transform_6(%arg0: i32) -> (i32, i32) {
    %c0_i32 = arith.constant 0 : i32
    %c0_i32_0 = arith.constant 0 : i32
    %c0_i32_1 = arith.constant 0 : i32
    return %c0_i32, %c0_i32_0 : i32, i32
  }
  func.func @transform_7(%arg0: i32) -> (i32, i32) {
    %c0_i32 = arith.constant 0 : i32
    %c0_i32_0 = arith.constant 0 : i32
    return %arg0, %c0_i32 : i32, i32
  }
}

</mosaic_0001>

<bundles_post_ra>
// kernel: tpu_custom_call.1
= control target key start
LH: loop header
LB: loop body
LE: loop exit
PB: predicated region body
PF: predicated region fallthrough
CT: control target
= control target key end

     0   :  { %12 = vsyncpa [#allocation3], 0  ;;  %s4141_s0 = inlined_call_operand.hbm [shape: f32[8,128], index: 0, kind: input, shape index: {}]   ;;  %s4142_s1 = inlined_call_operand.hbm [shape: bf16[128,1024], index: 1, kind: input, shape index: {}]   ;;  %s4143_s2 = inlined_call_operand.hbm [shape: f32[1,1024], index: 2, kind: input, shape index: {}]   ;;  %s4144_s3 = inlined_call_operand.hbm [shape: bf16[1024,512], index: 3, kind: input, shape index: {}]   ;;  %s4145_s4 = inlined_call_operand.vmem [shape: f32[1,512], index: 4, kind: input, shape index: {}]   ;;  %s4146_s5 = inlined_call_operand.hbm [shape: bf16[512,128], index: 5, kind: input, shape index: {}]   ;;  %s4147_s6 = inlined_call_operand.vmem [shape: f32[1,128], index: 6, kind: input, shape index: {}]   ;;  %s4148_s7 = inlined_call_operand.hbm [shape: f32[8,128], index: 7, kind: output, shape index: {}]  }
   0x1   :  { %13 = vsyncpa [#allocation6], 0 }
   0x2   :  { %14 = vsyncpa [#allocation9], 0 }
   0x3   :  { %15 = vsyncpa [#allocation4], 0  ;;  %s3949_s24 = smov [#allocation5]   ;;  %s3809_s28 = scalar_lea.hbm %s4142_s1, 8192 }
   0x4   :  { %s31_s25 = sshll.u32 %s3949_s24, 4  ;;  %p3810_p0 = scmp.ne.s32.totalorder %s4142_s1, %s3809_s28  ;;  %s32_s25 = int_to_ptr.vmem [resolvable:$true] %s31_s25 }
   0x5   :  { %p3813_p1 = scmp.lt.u32.totalorder %s3809_s28, %s4142_s1 }
   0x7   :  { %p3815_p2 = pnand %p3813_p1, %p3810_p0 }
   0x9   :  { %3818 = shalt.err (!%p3815_p2)
}
   0xa   :  { %s3819_s10 = scalar_lea.vmem %s32_s25, 8192  ;;  %p3824_p4 = scmp.lt.s32.totalorder %s32_s25, %s32_s25 }
   0xb   :  { %p3820_p3 = scmp.ne.s32.totalorder %s32_s25, %s3819_s10  ;;  %p3825_p5 = scmp.lt.s32.totalorder %s3819_s10, %s3819_s10 }
   0xd   :  { %p3826_p6 = por %p3825_p5, %p3824_p4 }
   0xf   :  { %p3827_p7 = pnand %p3826_p6, %p3820_p3 }
  0x11   :  { %3830 = shalt.err (!%p3827_p7)
}
  0x12   :  { %s3950_s11 = smov 512   ;;  %s3951_s12 = smov 32  }
  0x13   :  { %37 = dma.hbm_to_vmem [thread:$0]  %s4142_s1, 8192, %s32_s25, [#allocation6], %s3950_s11, %s3950_s11, %s3951_s12  }
  0x14   :  { %s3952_s15 = smov [#allocation8]   ;;  %s3831_s19 = scalar_lea.hbm %s4144_s3, 32768 }
  0x15   :  { %s53_s16 = sshll.u32 %s3952_s15, 4  ;;  %p3832_p8 = scmp.ne.s32.totalorder %s4144_s3, %s3831_s19  ;;  %s54_s16 = int_to_ptr.vmem [resolvable:$true] %s53_s16 }
  0x16   :  { %p3835_p9 = scmp.lt.u32.totalorder %s3831_s19, %s4144_s3 }
  0x18   :  { %p3837_p10 = pnand %p3835_p9, %p3832_p8 }
  0x1a   :  { %3840 = shalt.err (!%p3837_p10)
}
  0x1b   :  { %s3841_s24 = scalar_lea.vmem %s54_s16, 32768  ;;  %p3846_p12 = scmp.lt.s32.totalorder %s54_s16, %s54_s16 }
  0x1c   :  { %p3842_p11 = scmp.ne.s32.totalorder %s54_s16, %s3841_s24  ;;  %p3847_p13 = scmp.lt.s32.totalorder %s3841_s24, %s3841_s24 }
  0x1e   :  { %p3848_p0 = por %p3847_p13, %p3846_p12 }
  0x20   :  { %p3849_p1 = pnand %p3848_p0, %p3842_p11 }
  0x22   :  { %3852 = shalt.err (!%p3849_p1)
}
  0x23   :  { %s3953_s1 = smov 256   ;;  %s3954_s25 = smov 16  }
  0x24   :  { %59 = dma.hbm_to_vmem [thread:$0]  %s4144_s3, 32768, %s54_s16, [#allocation9], %s3953_s1, %s3953_s1, %s3954_s25  }
  0x25   :  { %s3955_s28 = smov [#allocation2]   ;;  %s3956_s30 = smov [#allocation7]  }
  0x26   :  { %s22_s29 = sshll.u32 %s3955_s28, 4  ;;  %s44_s8 = sshll.u32 %s3956_s30, 4  ;;  %s23_s29 = int_to_ptr.vmem [resolvable:$true] %s22_s29  ;;  %s45_s8 = int_to_ptr.vmem [resolvable:$true] %s44_s8 }
  0x27   :  { %s3853_s11 = scalar_lea.hbm %s4141_s0, 128 }
  0x28   :  { %p3854_p2 = scmp.ne.s32.totalorder %s4141_s0, %s3853_s11  ;;  %p3857_p3 = scmp.lt.u32.totalorder %s3853_s11, %s4141_s0 }
  0x2a   :  { %p3859_p4 = pnand %p3857_p3, %p3854_p2 }
  0x2c   :  { %3862 = shalt.err (!%p3859_p4)
}
  0x2d   :  { %s3863_s3 = scalar_lea.vmem %s23_s29, 128  ;;  %p3868_p6 = scmp.lt.s32.totalorder %s23_s29, %s23_s29 }
  0x2e   :  { %p3864_p5 = scmp.ne.s32.totalorder %s23_s29, %s3863_s3  ;;  %p3869_p7 = scmp.lt.s32.totalorder %s3863_s3, %s3863_s3 }
  0x30   :  { %p3870_p8 = por %p3869_p7, %p3868_p6 }
  0x32   :  { %p3871_p9 = pnand %p3870_p8, %p3864_p5 }
  0x34   :  { %3874 = shalt.err (!%p3871_p9)
}
  0x35   :  { %25 = dma.hbm_to_vmem [thread:$0]  %s4141_s0, 128, %s23_s29, [#allocation3]  }
  0x36   :  { %s3875_s20 = scalar_lea.hbm %s4143_s2, 128 }
  0x37   :  { %p3876_p10 = scmp.ne.s32.totalorder %s4143_s2, %s3875_s20  ;;  %p3879_p11 = scmp.lt.u32.totalorder %s3875_s20, %s4143_s2 }
  0x39   :  { %p3881_p12 = pnand %p3879_p11, %p3876_p10 }
  0x3b   :  { %3884 = shalt.err (!%p3881_p12)
}
  0x3c   :  { %s3885_s1 = scalar_lea.vmem %s45_s8, 128  ;;  %p3890_p0 = scmp.lt.s32.totalorder %s45_s8, %s45_s8 }
  0x3d   :  { %p3886_p13 = scmp.ne.s32.totalorder %s45_s8, %s3885_s1  ;;  %p3891_p1 = scmp.lt.s32.totalorder %s3885_s1, %s3885_s1 }
  0x3f   :  { %p3892_p2 = por %p3891_p1, %p3890_p0 }
  0x41   :  { %p3893_p3 = pnand %p3892_p2, %p3886_p13 }
  0x43   :  { %3896 = shalt.err (!%p3893_p3)
}
  0x44   :  { %47 = dma.hbm_to_vmem [thread:$0]  %s4143_s2, 128, %s45_s8, [#allocation6]  }
  0x45   :  { %s3957_s26 = smov [#allocation10]   ;;  %s3897_s30 = scalar_lea.hbm %s4146_s5, 4096 }
  0x46   :  { %s67_s27 = sshll.u32 %s3957_s26, 4  ;;  %p3898_p4 = scmp.ne.s32.totalorder %s4146_s5, %s3897_s30  ;;  %s68_s27 = int_to_ptr.vmem [resolvable:$true] %s67_s27 }
  0x47   :  { %p3901_p5 = scmp.lt.u32.totalorder %s3897_s30, %s4146_s5 }
  0x49   :  { %p3903_p6 = pnand %p3901_p5, %p3898_p4 }
  0x4b   :  { %3906 = shalt.err (!%p3903_p6)
}
  0x4c   :  { %s3907_s13 = scalar_lea.vmem %s68_s27, 4096  ;;  %p3912_p8 = scmp.lt.s32.totalorder %s68_s27, %s68_s27 }
  0x4d   :  { %p3908_p7 = scmp.ne.s32.totalorder %s68_s27, %s3907_s13  ;;  %p3913_p9 = scmp.lt.s32.totalorder %s3907_s13, %s3907_s13 }
  0x4f   :  { %p3914_p10 = por %p3913_p9, %p3912_p8 }
  0x51   :  { %p3915_p11 = pnand %p3914_p10, %p3908_p7 }
  0x53   :  { %3918 = shalt.err (!%p3915_p11)
}
  0x54   :  { %s3958_s2 = smov 64   ;;  %s3959_s8 = smov 4  }
  0x55   :  { %73 = dma.hbm_to_vmem [thread:$0]  %s4146_s5, 4096, %s68_s27, [#allocation9], %s3958_s2, %s3958_s2, %s3959_s8  }
  0x56   :  { %3941 = dma.done.wait [#allocation3], 128  }
  0x57   :  { %3942 = vsyncadd [#allocation3], 4294967168 }
  0x58   :  { %3943 = dma.done.wait [#allocation6], 8320  }
  0x59   :  { %3944 = vsyncadd [#allocation6], 4294958976 }
  0x5a   :  { %3945 = dma.done.wait [#allocation9], 36864  }
  0x5b   :  { %3946 = vsyncadd [#allocation9], 4294930432  ;;  %v3960_v0 = vmov 0   ;;  %v94_v1 = vld [vmem:[#allocation5] sm:$0xff]  ;;  %v95_v14 = vld [vmem:[#allocation5 + $0x8] sm:$0xff]  ;;  %s3961_s17 = smov [#allocation11]  }
  0x5c   :  { %552 = vmatprep.mubr.bf16.mxu0 %v3960_v0  ;;  %593 = vmatprep.mubr.bf16.mxu1 %v3960_v0  ;;  %v98_v2 = vld [vmem:[#allocation5 + $0x20] sm:$0xff]  ;;  %v99_v15 = vld [vmem:[#allocation5 + $0x28] sm:$0xff]  ;;  %v92_v57 = vld [vmem:[#allocation2] sm:$0xff]  ;;  %s2944_s18 = sshll.u32 %s3961_s17, 4  ;;  %s2945_s18 = int_to_ptr.vmem [resolvable:$true] %s2944_s18 }
  0x5d   :  { %v102_v3 = vld [vmem:[#allocation5 + $0x40] sm:$0xff]  ;;  %v2956_v4 = vcombine.high %v94_v1, %v98_v2  ;;  %v2955_v5 = vcombine.low %v94_v1, %v98_v2  ;;  %v103_v16 = vld [vmem:[#allocation5 + $0x48] sm:$0xff]  ;;  %v2958_v18 = vcombine.high %v95_v14, %v99_v15  ;;  %v2957_v19 = vcombine.low %v95_v14, %v99_v15  ;;  %v96_v59 = vld [vmem:[#allocation5 + $0x10] sm:$0xff]  ;;  %s3919_s19 = scalar_lea.vmem %s2945_s18, 128  ;;  %p3924_p13 = scmp.lt.s32.totalorder %s2945_s18, %s2945_s18 }
  0x5e   :  { %v106_v6 = vld [vmem:[#allocation5 + $0x60] sm:$0xff]  ;;  %v107_v17 = vld [vmem:[#allocation5 + $0x68] sm:$0xff]  ;;  %v100_v60 = vld [vmem:[#allocation5 + $0x30] sm:$0xff]  ;;  %p3920_p12 = scmp.ne.s32.totalorder %s2945_s18, %s3919_s19  ;;  %p3925_p0 = scmp.lt.s32.totalorder %s3919_s19, %s3919_s19 }
  0x5f   :  { %v2964_v7 = vcombine.high %v102_v3, %v106_v6  ;;  %v110_v8 = vld [vmem:[#allocation5 + $0x80] sm:$0xff]  ;;  %520 = vmatprep.subr.bf16.mxu0 %v2956_v4  ;;  %v2963_v10 = vcombine.low %v102_v3, %v106_v6  ;;  %v2966_v20 = vcombine.high %v103_v16, %v107_v17  ;;  %v111_v22 = vld [vmem:[#allocation5 + $0x88] sm:$0xff]  ;;  %561 = vmatprep.subr.bf16.mxu1 %v2958_v18  ;;  %v104_v4 = vld [vmem:[#allocation5 + $0x50] sm:$0xff] }
  0x60   :  { %v114_v9 = vld [vmem:[#allocation5 + $0xa0] sm:$0xff]  ;;  %521 = vmatpush1.bf16.msra.mxu0 %v2955_v5  ;;  %v115_v23 = vld [vmem:[#allocation5 + $0xa8] sm:$0xff]  ;;  %562 = vmatpush1.bf16.msra.mxu1 %v2957_v19  ;;  %v2965_v27 = vcombine.low %v103_v16, %v107_v17  ;;  %v2960_v2 = vcombine.high %v96_v59, %v100_v60  ;;  %v108_v5 = vld [vmem:[#allocation5 + $0x70] sm:$0xff]  ;;  %v4064_v6 = vpack.c.bf16 %v92_v57, %v92_v57  ;;  %p3926_p1 = por %p3925_p0, %p3924_p13 }
  0x61   :  { %522 = vmatprep.subr.bf16.mxu0 %v2964_v7  ;;  %v2972_v11 = vcombine.high %v110_v8, %v114_v9  ;;  %v118_v12 = vld [vmem:[#allocation5 + $0xc0] sm:$0xff]  ;;  %v2971_v21 = vcombine.low %v110_v8, %v114_v9  ;;  %563 = vmatprep.subr.bf16.mxu1 %v2966_v20  ;;  %v2974_v28 = vcombine.high %v111_v22, %v115_v23  ;;  %v119_v30 = vld [vmem:[#allocation5 + $0xc8] sm:$0xff]  ;;  %v97_v8 = vld [vmem:[#allocation5 + $0x18] sm:$0xff] }
  0x62   :  { %v122_v13 = vld [vmem:[#allocation5 + $0xe0] sm:$0xff]  ;;  %v123_v31 = vld [vmem:[#allocation5 + $0xe8] sm:$0xff]  ;;  %v2973_v35 = vcombine.low %v111_v22, %v115_v23  ;;  %v2959_v9 = vcombine.low %v96_v59, %v100_v60  ;;  %v116_v14 = vld [vmem:[#allocation5 + $0xb0] sm:$0xff]  ;;  %v2967_v17 = vcombine.low %v104_v4, %v108_v5  ;;  %p3927_p2 = pnand %p3926_p1, %p3920_p12 }
  0x63   :  { %v2980_v24 = vcombine.high %v118_v12, %v122_v13  ;;  %v126_v25 = vld [vmem:[#allocation5 + $0x100] sm:$0xff]  ;;  %v2979_v29 = vcombine.low %v118_v12, %v122_v13  ;;  %v2982_v36 = vcombine.high %v119_v30, %v123_v31  ;;  %v127_v38 = vld [vmem:[#allocation5 + $0x108] sm:$0xff]  ;;  %v2981_v43 = vcombine.low %v119_v30, %v123_v31  ;;  %v112_v13 = vld [vmem:[#allocation5 + $0x90] sm:$0xff] }
  0x64   :  { %523 = vmatpush1.bf16.msra.mxu0 %v2963_v10  ;;  %v130_v26 = vld [vmem:[#allocation5 + $0x120] sm:$0xff]  ;;  %564 = vmatpush1.bf16.msra.mxu1 %v2965_v27  ;;  %v131_v39 = vld [vmem:[#allocation5 + $0x128] sm:$0xff]  ;;  %v101_v10 = vld [vmem:[#allocation5 + $0x38] sm:$0xff]  ;;  %v2976_v19 = vcombine.high %v112_v13, %v116_v14 }
  0x65   :  { %524 = vmatprep.subr.bf16.mxu0 %v2972_v11  ;;  %v2988_v32 = vcombine.high %v126_v25, %v130_v26  ;;  %v134_v33 = vld [vmem:[#allocation5 + $0x140] sm:$0xff]  ;;  %565 = vmatprep.subr.bf16.mxu1 %v2974_v28  ;;  %v2987_v37 = vcombine.low %v126_v25, %v130_v26  ;;  %v2990_v44 = vcombine.high %v127_v38, %v131_v39  ;;  %v135_v46 = vld [vmem:[#allocation5 + $0x148] sm:$0xff]  ;;  %v105_v16 = vld [vmem:[#allocation5 + $0x58] sm:$0xff] }
  0x66   :  { %v138_v34 = vld [vmem:[#allocation5 + $0x160] sm:$0xff]  ;;  %v139_v47 = vld [vmem:[#allocation5 + $0x168] sm:$0xff]  ;;  %v2989_v51 = vcombine.low %v127_v38, %v131_v39  ;;  %v2968_v11 = vcombine.high %v104_v4, %v108_v5  ;;  %v2962_v15 = vcombine.high %v97_v8, %v101_v10  ;;  %v109_v18 = vld [vmem:[#allocation5 + $0x78] sm:$0xff]  ;;  %v2961_v22 = vcombine.low %v97_v8, %v101_v10 }
  0x67   :  { %v2996_v40 = vcombine.high %v134_v33, %v138_v34  ;;  %v142_v41 = vld [vmem:[#allocation5 + $0x180] sm:$0xff]  ;;  %v2995_v45 = vcombine.low %v134_v33, %v138_v34  ;;  %v2998_v52 = vcombine.high %v135_v46, %v139_v47  ;;  %v143_v53 = vld [vmem:[#allocation5 + $0x188] sm:$0xff]  ;;  %v2997_v58 = vcombine.low %v135_v46, %v139_v47  ;;  %v120_v20 = vld [vmem:[#allocation5 + $0xd0] sm:$0xff] }
  0x68   :  { %525 = vmatpush1.bf16.msra.mxu0 %v2971_v21  ;;  %v146_v42 = vld [vmem:[#allocation5 + $0x1a0] sm:$0xff]  ;;  %566 = vmatpush1.bf16.msra.mxu1 %v2973_v35  ;;  %v147_v55 = vld [vmem:[#allocation5 + $0x1a8] sm:$0xff]  ;;  %v124_v21 = vld [vmem:[#allocation5 + $0xf0] sm:$0xff]  ;;  %v2970_v23 = vcombine.high %v105_v16, %v109_v18  ;;  %v2975_v25 = vcombine.low %v112_v13, %v116_v14  ;;  %v2969_v30 = vcombine.low %v105_v16, %v109_v18 }
  0x69   :  { %526 = vmatprep.subr.bf16.mxu0 %v2980_v24  ;;  %567 = vmatprep.subr.bf16.mxu1 %v2982_v36  ;;  %v3004_v48 = vcombine.high %v142_v41, %v146_v42  ;;  %v150_v49 = vld [vmem:[#allocation5 + $0x1c0] sm:$0xff]  ;;  %v3003_v54 = vcombine.low %v142_v41, %v146_v42  ;;  %v3006_v61 = vcombine.high %v143_v53, %v147_v55  ;;  %v151_v62 = vld [vmem:[#allocation5 + $0x1c8] sm:$0xff]  ;;  %v113_v24 = vld [vmem:[#allocation5 + $0x98] sm:$0xff] }
  0x6a   :  { %v154_v50 = vld [vmem:[#allocation5 + $0x1e0] sm:$0xff]  ;;  %v155_v1 = vld [vmem:[#allocation5 + $0x1e8] sm:$0xff]  ;;  %v3005_v3 = vcombine.low %v143_v53, %v147_v55  ;;  %v117_v26 = vld [vmem:[#allocation5 + $0xb8] sm:$0xff]  ;;  %v2984_v27 = vcombine.high %v120_v20, %v124_v21  ;;  %v2983_v33 = vcombine.low %v120_v20, %v124_v21 }
  0x6b   :  { %v3012_v56 = vcombine.high %v150_v49, %v154_v50  ;;  %v3011_v63 = vcombine.low %v150_v49, %v154_v50  ;;  %v3014_v7 = vcombine.high %v151_v62, %v155_v1  ;;  %v3013_v12 = vcombine.low %v151_v62, %v155_v1  ;;  %v128_v28 = vld [vmem:[#allocation5 + $0x110] sm:$0xff]  ;;  %v125_v34 = vld [vmem:[#allocation5 + $0xf8] sm:$0xff] }
  0x6c   :  { %527 = vmatpush1.bf16.msra.mxu0 %v2979_v29  ;;  %568 = vmatpush1.bf16.msra.mxu1 %v2981_v43  ;;  %v132_v29 = vld [vmem:[#allocation5 + $0x130] sm:$0xff]  ;;  %v2978_v31 = vcombine.high %v113_v24, %v117_v26  ;;  %v2977_v38 = vcombine.low %v113_v24, %v117_v26  ;;  %v133_v42 = vld [vmem:[#allocation5 + $0x138] sm:$0xff] }
  0x6d   :  { %528 = vmatprep.subr.bf16.mxu0 %v2988_v32  ;;  %569 = vmatprep.subr.bf16.mxu1 %v2990_v44  ;;  %v121_v32 = vld [vmem:[#allocation5 + $0xd8] sm:$0xff]  ;;  %v2992_v35 = vcombine.high %v128_v28, %v132_v29  ;;  %v136_v36 = vld [vmem:[#allocation5 + $0x150] sm:$0xff]  ;;  %v2991_v41 = vcombine.low %v128_v28, %v132_v29 }
  0x6e   :  { %v2986_v39 = vcombine.high %v121_v32, %v125_v34  ;;  %v144_v43 = vld [vmem:[#allocation5 + $0x190] sm:$0xff]  ;;  %v137_v47 = vld [vmem:[#allocation5 + $0x158] sm:$0xff] }
  0x6f   :  { %v148_v44 = vld [vmem:[#allocation5 + $0x1b0] sm:$0xff]  ;;  %v141_v49 = vld [vmem:[#allocation5 + $0x178] sm:$0xff] }
  0x70   :  { %529 = vmatpush1.bf16.msra.mxu0 %v2987_v37  ;;  %570 = vmatpush1.bf16.msra.mxu1 %v2989_v51  ;;  %v140_v37 = vld [vmem:[#allocation5 + $0x170] sm:$0xff]  ;;  %v3008_v50 = vcombine.high %v144_v43, %v148_v44  ;;  %v145_v55 = vld [vmem:[#allocation5 + $0x198] sm:$0xff]  ;;  %v3001_v59 = vcombine.low %v137_v47, %v141_v49 }
  0x71   :  { %530 = vmatprep.subr.bf16.mxu0 %v2996_v40  ;;  %571 = vmatprep.subr.bf16.mxu1 %v2998_v52  ;;  %v129_v40 = vld [vmem:[#allocation5 + $0x118] sm:$0xff]  ;;  %v152_v51 = vld [vmem:[#allocation5 + $0x1d0] sm:$0xff] }
  0x72   :  { %v2994_v46 = vcombine.high %v129_v40, %v133_v42  ;;  %v156_v52 = vld [vmem:[#allocation5 + $0x1f0] sm:$0xff]  ;;  %v2993_v53 = vcombine.low %v129_v40, %v133_v42  ;;  %v149_v57 = vld [vmem:[#allocation5 + $0x1b8] sm:$0xff] }
  0x73   :  { %v153_v60 = vld [vmem:[#allocation5 + $0x1d8] sm:$0xff]  ;;  %v3010_v62 = vcombine.high %v145_v55, %v149_v57  ;;  %v3015_v1 = vcombine.low %v152_v51, %v156_v52  ;;  %v3410_v16 = vld [vmem:[#allocation8 + $0x4c] ss:$16 sps:$4 sm:$0xff]   ;;  %v3420_v26 = vld [vmem:[#allocation8 + $0x88] ss:$16 sps:$4 sm:$0xff]  }
  0x74   :  { %531 = vmatpush1.bf16.msra.mxu0 %v2995_v45  ;;  %572 = vmatpush1.bf16.msra.mxu1 %v2997_v58  ;;  %v2985_v45 = vcombine.low %v121_v32, %v125_v34  ;;  %v3016_v58 = vcombine.high %v152_v51, %v156_v52  ;;  %v3401_v5 = vld [vmem:[#allocation8 + $0x24] ss:$16 sps:$4 sm:$0xff]   ;;  %v3405_v13 = vld [vmem:[#allocation8 + $0x40] ss:$16 sps:$4 sm:$0xff]   ;;  %v3416_v20 = vld [vmem:[#allocation8 + $0x6c] ss:$16 sps:$4 sm:$0xff]  }
  0x75   :  { %532 = vmatprep.subr.bf16.mxu0 %v3004_v48  ;;  %573 = vmatprep.subr.bf16.mxu1 %v3006_v61  ;;  %v2999_v48 = vcombine.low %v136_v36, %v140_v37  ;;  %v157_v61 = vld [vmem:[#allocation5 + $0x1f8] sm:$0xff]  ;;  %v3422_v24 = vld [vmem:[#allocation8 + $0x8c] ss:$16 sps:$4 sm:$0xff]   ;;  %v3432_v34 = vld [vmem:[#allocation8 + $0xc8] ss:$16 sps:$4 sm:$0xff]  }
  0x76   :  { %v3018_v4 = vcombine.high %v153_v60, %v157_v61  ;;  %v3017_v8 = vcombine.low %v153_v60, %v157_v61  ;;  %v3407_v10 = vld [vmem:[#allocation8 + $0x44] ss:$16 sps:$4 sm:$0xff]   ;;  %v3417_v21 = vld [vmem:[#allocation8 + $0x80] ss:$16 sps:$4 sm:$0xff]   ;;  %v3444_v42 = vld [vmem:[#allocation8 + $0x108] ss:$16 sps:$4 sm:$0xff]  }
  0x77   :  { %v3413_v14 = vld [vmem:[#allocation8 + $0x64] ss:$16 sps:$4 sm:$0xff]   ;;  %v3429_v28 = vld [vmem:[#allocation8 + $0xc0] ss:$16 sps:$4 sm:$0xff]   ;;  %v3482_v61 = vld [vmem:[#allocation8 + $0x1cc] ss:$16 sps:$4 sm:$0xff]  }
  0x78   :  { %533 = vmatpush1.bf16.msra.mxu0 %v3003_v54  ;;  %574 = vmatpush1.bf16.msra.mxu1 %v3005_v3  ;;  %v3002_v54 = vcombine.high %v137_v47, %v141_v49  ;;  %v3393_v3 = vld [vmem:[#allocation8] ss:$16 sps:$4 sm:$0xff]   ;;  %v3419_v18 = vld [vmem:[#allocation8 + $0x84] ss:$16 sps:$4 sm:$0xff]   ;;  %v3456_v49 = vld [vmem:[#allocation8 + $0x148] ss:$16 sps:$4 sm:$0xff]  }
  0x79   :  { %534 = vmatprep.subr.bf16.mxu0 %v3012_v56  ;;  %575 = vmatprep.subr.bf16.mxu1 %v3014_v7  ;;  %v3007_v56 = vcombine.low %v144_v43, %v148_v44  ;;  %v3398_v7 = vld [vmem:[#allocation8 + $0xc] ss:$16 sps:$4 sm:$0xff]   ;;  %v3437_v29 = vld [vmem:[#allocation8 + $0xe4] ss:$16 sps:$4 sm:$0xff]   ;;  %v3435_v32 = vld [vmem:[#allocation8 + $0xe0] ss:$16 sps:$4 sm:$0xff]  }
  0x7a   :  { %v3447_v40 = vld [vmem:[#allocation8 + $0x120] ss:$16 sps:$4 sm:$0xff]   ;;  %v3461_v44 = vld [vmem:[#allocation8 + $0x164] ss:$16 sps:$4 sm:$0xff]  }
  0x7b   :  { %v3453_v43 = vld [vmem:[#allocation8 + $0x140] ss:$16 sps:$4 sm:$0xff]   ;;  %v3473_v52 = vld [vmem:[#allocation8 + $0x1a4] ss:$16 sps:$4 sm:$0xff]  }
  0x7c   :  { %535 = vmatpush1.bf16.msra.mxu0 %v3011_v63  ;;  %576 = vmatpush1.bf16.msra.mxu1 %v3013_v12  ;;  %v3395_v63 = vld [vmem:[#allocation8 + $0x4] ss:$16 sps:$4 sm:$0xff]   ;;  %v3404_v12 = vld [vmem:[#allocation8 + $0x2c] ss:$16 sps:$4 sm:$0xff]   ;;  %v3459_v47 = vld [vmem:[#allocation8 + $0x160] ss:$16 sps:$4 sm:$0xff]  }
  0x7d   :  { %602 = vmatprep.subr.bf16.mxu0 %v2960_v2  ;;  %643 = vmatprep.subr.bf16.mxu1 %v2962_v15  ;;  %v3009_v2 = vcombine.low %v145_v55, %v149_v57  ;;  %v3402_v15 = vld [vmem:[#allocation8 + $0x28] ss:$16 sps:$4 sm:$0xff]   ;;  %v3465_v51 = vld [vmem:[#allocation8 + $0x180] ss:$16 sps:$4 sm:$0xff]   ;;  %v3476_v57 = vld [vmem:[#allocation8 + $0x1ac] ss:$16 sps:$4 sm:$0xff]  }
  0x7e   :  { %v3468_v55 = vld [vmem:[#allocation8 + $0x188] ss:$16 sps:$4 sm:$0xff]   ;;  %v3477_v60 = vld [vmem:[#allocation8 + $0x1c0] ss:$16 sps:$4 sm:$0xff]  }
  0x7f   :  { %553 = vmatmul.mubr.bf16.vlgmr.msra.gmra.mrb[0].mxu0 %v4064_v6  ;;  %594 = vmatmul.mubr.bf16.vlgmr.msra.gmra.mrb[0].mxu1 %v4064_v6 }
  0x80   :  { %603 = vmatpush1.bf16.msra.mxu0 %v2959_v9  ;;  %634 = vmatprep.mubr.bf16.mxu0 %v3960_v0  ;;  %v3399_v9 = vld [vmem:[#allocation8 + $0x20] ss:$16 sps:$4 sm:$0xff]  }
  0x81   :  { %604 = vmatprep.subr.bf16.mxu0 %v2968_v11  ;;  %644 = vmatpush1.bf16.msra.mxu1 %v2961_v22  ;;  %v3396_v11 = vld [vmem:[#allocation8 + $0x8] ss:$16 sps:$4 sm:$0xff]   ;;  %v3425_v22 = vld [vmem:[#allocation8 + $0xa4] ss:$16 sps:$4 sm:$0xff]  }
  0x82   :  { %675 = vmatprep.mubr.bf16.mxu1 %v3960_v0  ;;  %645 = vmatprep.subr.bf16.mxu1 %v2970_v23  ;;  %v3000_v0 = vcombine.high %v136_v36, %v140_v37  ;;  %v3414_v23 = vld [vmem:[#allocation8 + $0x68] ss:$16 sps:$4 sm:$0xff]   ;;  %v3441_v36 = vld [vmem:[#allocation8 + $0x100] ss:$16 sps:$4 sm:$0xff]   ;;  %v3449_v37 = vld [vmem:[#allocation8 + $0x124] ss:$16 sps:$4 sm:$0xff]  }
  0x84   :  { %605 = vmatpush1.bf16.msra.mxu0 %v2967_v17  ;;  %v3411_v17 = vld [vmem:[#allocation8 + $0x60] ss:$16 sps:$4 sm:$0xff]  }
  0x85   :  { %606 = vmatprep.subr.bf16.mxu0 %v2976_v19  ;;  %646 = vmatpush1.bf16.msra.mxu1 %v2969_v30  ;;  %v3408_v19 = vld [vmem:[#allocation8 + $0x48] ss:$16 sps:$4 sm:$0xff]  }
  0x86   :  { %647 = vmatprep.subr.bf16.mxu1 %v2978_v31  ;;  %v3426_v30 = vld [vmem:[#allocation8 + $0xa8] ss:$16 sps:$4 sm:$0xff]   ;;  %v3434_v31 = vld [vmem:[#allocation8 + $0xcc] ss:$16 sps:$4 sm:$0xff]  }
  0x88   :  { %607 = vmatpush1.bf16.msra.mxu0 %v2975_v25  ;;  %v3431_v25 = vld [vmem:[#allocation8 + $0xc4] ss:$16 sps:$4 sm:$0xff]  }
  0x89   :  { %608 = vmatprep.subr.bf16.mxu0 %v2984_v27  ;;  %648 = vmatpush1.bf16.msra.mxu1 %v2977_v38  ;;  %v3428_v27 = vld [vmem:[#allocation8 + $0xac] ss:$16 sps:$4 sm:$0xff]   ;;  %v3438_v38 = vld [vmem:[#allocation8 + $0xe8] ss:$16 sps:$4 sm:$0xff]  }
  0x8a   :  { %649 = vmatprep.subr.bf16.mxu1 %v2986_v39  ;;  %v3446_v39 = vld [vmem:[#allocation8 + $0x10c] ss:$16 sps:$4 sm:$0xff]  }
  0x8c   :  { %609 = vmatpush1.bf16.msra.mxu0 %v2983_v33  ;;  %v3443_v33 = vld [vmem:[#allocation8 + $0x104] ss:$16 sps:$4 sm:$0xff]  }
  0x8d   :  { %610 = vmatprep.subr.bf16.mxu0 %v2992_v35  ;;  %650 = vmatpush1.bf16.msra.mxu1 %v2985_v45  ;;  %v3440_v35 = vld [vmem:[#allocation8 + $0xec] ss:$16 sps:$4 sm:$0xff]   ;;  %v3450_v45 = vld [vmem:[#allocation8 + $0x128] ss:$16 sps:$4 sm:$0xff]  }
  0x8e   :  { %651 = vmatprep.subr.bf16.mxu1 %v2994_v46  ;;  %v3458_v46 = vld [vmem:[#allocation8 + $0x14c] ss:$16 sps:$4 sm:$0xff]  }
  0x90   :  { %611 = vmatpush1.bf16.msra.mxu0 %v2991_v41  ;;  %v3455_v41 = vld [vmem:[#allocation8 + $0x144] ss:$16 sps:$4 sm:$0xff]  }
  0x91   :  { %612 = vmatprep.subr.bf16.mxu0 %v3000_v0  ;;  %652 = vmatpush1.bf16.msra.mxu1 %v2993_v53  ;;  %v3452_v0 = vld [vmem:[#allocation8 + $0x12c] ss:$16 sps:$4 sm:$0xff]   ;;  %v3462_v53 = vld [vmem:[#allocation8 + $0x168] ss:$16 sps:$4 sm:$0xff]  }
  0x92   :  { %653 = vmatprep.subr.bf16.mxu1 %v3002_v54  ;;  %v3470_v54 = vld [vmem:[#allocation8 + $0x18c] ss:$16 sps:$4 sm:$0xff]  }
  0x94   :  { %613 = vmatpush1.bf16.msra.mxu0 %v2999_v48  ;;  %v3467_v48 = vld [vmem:[#allocation8 + $0x184] ss:$16 sps:$4 sm:$0xff]  }
  0x95   :  { %614 = vmatprep.subr.bf16.mxu0 %v3008_v50  ;;  %654 = vmatpush1.bf16.msra.mxu1 %v3001_v59  ;;  %v3464_v50 = vld [vmem:[#allocation8 + $0x16c] ss:$16 sps:$4 sm:$0xff]   ;;  %v3474_v59 = vld [vmem:[#allocation8 + $0x1a8] ss:$16 sps:$4 sm:$0xff]  }
  0x96   :  { %655 = vmatprep.subr.bf16.mxu1 %v3010_v62  ;;  %v3485_v62 = vld [vmem:[#allocation8 + $0x1e4] ss:$16 sps:$4 sm:$0xff]  }
  0x98   :  { %615 = vmatpush1.bf16.msra.mxu0 %v3007_v56  ;;  %v3471_v56 = vld [vmem:[#allocation8 + $0x1a0] ss:$16 sps:$4 sm:$0xff]  }
  0x99   :  { %616 = vmatprep.subr.bf16.mxu0 %v3016_v58  ;;  %656 = vmatpush1.bf16.msra.mxu1 %v3009_v2  ;;  %v3479_v58 = vld [vmem:[#allocation8 + $0x1c4] ss:$16 sps:$4 sm:$0xff]   ;;  %v3488_v2 = vld [vmem:[#allocation8 + $0x1ec] ss:$16 sps:$4 sm:$0xff]  }
  0x9a   :  { %657 = vmatprep.subr.bf16.mxu1 %v3018_v4  ;;  %v3486_v4 = vld [vmem:[#allocation8 + $0x1e8] ss:$16 sps:$4 sm:$0xff]  }
  0x9c   :  { %617 = vmatpush1.bf16.msra.mxu0 %v3015_v1  ;;  %v3483_v1 = vld [vmem:[#allocation8 + $0x1e0] ss:$16 sps:$4 sm:$0xff]  }
  0x9d   :  { %2258 = vmatprep.subr.bf16.mxu0 %v3395_v63  ;;  %658 = vmatpush1.bf16.msra.mxu1 %v3017_v8  ;;  %v3480_v63 = vld [vmem:[#allocation8 + $0x1c8] ss:$16 sps:$4 sm:$0xff]  }
  0x9e   :  { %2422 = vmatprep.subr.bf16.mxu1 %v3398_v7  ;;  %v160_v7 = vlaneseq }
  0x9f   :  { %635 = vmatmul.mubr.bf16.vlgmr.msra.gmra.mrb[4].mxu0 %v4064_v6 }
  0xa0   :  { %2259 = vmatpush1.bf16.msra.mxu0 %v3393_v3  ;;  %676 = vmatmul.mubr.bf16.vlgmr.msra.gmra.mrb[4].mxu1 %v4064_v6  ;;  %v3423_v6 = vld [vmem:[#allocation8 + $0xa0] ss:$16 sps:$4 sm:$0xff]   ;;  %v3491_v3 = vld [vmem:[#allocation8 + $0x204] ss:$16 sps:$4 sm:$0xff]   ;;  %v4072_v8 = vshrl.u32 %v160_v7, 7 }
  0xa1   :  { %2260 = vmatprep.subr.bf16.mxu0 %v3401_v5  ;;  %2423 = vmatpush1.bf16.msra.mxu1 %v3396_v11  ;;  %v3494_v5 = vld [vmem:[#allocation8 + $0x20c] ss:$16 sps:$4 sm:$0xff]  }
  0xa2   :  { %2424 = vmatprep.subr.bf16.mxu1 %v3404_v12  ;;  %v166_v11 = vsub.s32 1, %v4072_v8 }
  0xa4   :  { %2261 = vmatpush1.bf16.msra.mxu0 %v3399_v9  ;;  %v162_v9 = vsub.s32 0, %v4072_v8 }
  0xa5   :  { %2262 = vmatprep.subr.bf16.mxu0 %v3407_v10  ;;  %2425 = vmatpush1.bf16.msra.mxu1 %v3402_v15  ;;  %v4075_v10 = vld [vmem:[#allocation7] sm:$0xff]  ;;  %v174_v15 = vsub.s32 3, %v4072_v8 }
  0xa6   :  { %2426 = vmatprep.subr.bf16.mxu1 %v3410_v16  ;;  %v163_v12 = vrot.slane %v4075_v10, %v162_v9 }
  0xa8   :  { %2263 = vmatpush1.bf16.msra.mxu0 %v3405_v13  ;;  %v167_v13 = vrot.slane %v4075_v10, %v166_v11 }
  0xa9   :  { %2264 = vmatprep.subr.bf16.mxu0 %v3413_v14  ;;  %2427 = vmatpush1.bf16.msra.mxu1 %v3408_v19 }
  0xaa   :  { %2428 = vmatprep.subr.bf16.mxu1 %v3416_v20 }
  0xac   :  { %2265 = vmatpush1.bf16.msra.mxu0 %v3411_v17 }
  0xad   :  { %2266 = vmatprep.subr.bf16.mxu0 %v3419_v18  ;;  %2429 = vmatpush1.bf16.msra.mxu1 %v3414_v23  ;;  %v175_v23 = vrot.slane %v4075_v10, %v174_v15 }
  0xae   :  { %2430 = vmatprep.subr.bf16.mxu1 %v3422_v24 }
  0xb0   :  { %2267 = vmatpush1.bf16.msra.mxu0 %v3417_v21 }
  0xb1   :  { %2268 = vmatprep.subr.bf16.mxu0 %v3425_v22  ;;  %2431 = vmatpush1.bf16.msra.mxu1 %v3420_v26 }
  0xb2   :  { %2432 = vmatprep.subr.bf16.mxu1 %v3428_v27 }
  0xb4   :  { %2269 = vmatpush1.bf16.msra.mxu0 %v3423_v6  ;;  %v3489_v6 = vld [vmem:[#allocation8 + $0x200] ss:$16 sps:$4 sm:$0xff]  }
  0xb5   :  { %2270 = vmatprep.subr.bf16.mxu0 %v3431_v25  ;;  %2433 = vmatpush1.bf16.msra.mxu1 %v3426_v30  ;;  %v3492_v25 = vld [vmem:[#allocation8 + $0x208] ss:$16 sps:$4 sm:$0xff]  }
  0xb6   :  { %2434 = vmatprep.subr.bf16.mxu1 %v3434_v31 }
  0xb8   :  { %2271 = vmatpush1.bf16.msra.mxu0 %v3429_v28  ;;  %v3497_v28 = vld [vmem:[#allocation8 + $0x224] ss:$16 sps:$4 sm:$0xff]  }
  0xb9   :  { %2272 = vmatprep.subr.bf16.mxu0 %v3437_v29  ;;  %2435 = vmatpush1.bf16.msra.mxu1 %v3432_v34  ;;  %v3500_v29 = vld [vmem:[#allocation8 + $0x22c] ss:$16 sps:$4 sm:$0xff]   ;;  %v3495_v34 = vld [vmem:[#allocation8 + $0x220] ss:$16 sps:$4 sm:$0xff]  }
  0xba   :  { %2436 = vmatprep.subr.bf16.mxu1 %v3440_v35  ;;  %v3498_v35 = vld [vmem:[#allocation8 + $0x228] ss:$16 sps:$4 sm:$0xff]  }
  0xbc   :  { %2273 = vmatpush1.bf16.msra.mxu0 %v3435_v32 }
  0xbd   :  { %2274 = vmatprep.subr.bf16.mxu0 %v3443_v33  ;;  %2437 = vmatpush1.bf16.msra.mxu1 %v3438_v38  ;;  %v3506_v38 = vld [vmem:[#allocation8 + $0x24c] ss:$16 sps:$4 sm:$0xff]  }
  0xbe   :  { %2438 = vmatprep.subr.bf16.mxu1 %v3446_v39 }
  0xc0   :  { %2275 = vmatpush1.bf16.msra.mxu0 %v3441_v36 }
  0xc1   :  { %2276 = vmatprep.subr.bf16.mxu0 %v3449_v37  ;;  %2439 = vmatpush1.bf16.msra.mxu1 %v3444_v42  ;;  %v3503_v37 = vld [vmem:[#allocation8 + $0x244] ss:$16 sps:$4 sm:$0xff]  }
  0xc2   :  { %2440 = vmatprep.subr.bf16.mxu1 %v3452_v0  ;;  %v3509_v42 = vld [vmem:[#allocation8 + $0x264] ss:$16 sps:$4 sm:$0xff]   ;;  %v3512_v0 = vld [vmem:[#allocation8 + $0x26c] ss:$16 sps:$4 sm:$0xff]  }
  0xc4   :  { %2277 = vmatpush1.bf16.msra.mxu0 %v3447_v40  ;;  %v3501_v40 = vld [vmem:[#allocation8 + $0x240] ss:$16 sps:$4 sm:$0xff]  }
  0xc5   :  { %2278 = vmatprep.subr.bf16.mxu0 %v3455_v41  ;;  %2441 = vmatpush1.bf16.msra.mxu1 %v3450_v45  ;;  %v3504_v41 = vld [vmem:[#allocation8 + $0x248] ss:$16 sps:$4 sm:$0xff]   ;;  %v3515_v45 = vld [vmem:[#allocation8 + $0x284] ss:$16 sps:$4 sm:$0xff]  }
  0xc6   :  { %2442 = vmatprep.subr.bf16.mxu1 %v3458_v46  ;;  %v3518_v46 = vld [vmem:[#allocation8 + $0x28c] ss:$16 sps:$4 sm:$0xff]  }
  0xc8   :  { %2279 = vmatpush1.bf16.msra.mxu0 %v3453_v43  ;;  %v3507_v43 = vld [vmem:[#allocation8 + $0x260] ss:$16 sps:$4 sm:$0xff]  }
  0xc9   :  { %2280 = vmatprep.subr.bf16.mxu0 %v3461_v44  ;;  %2443 = vmatpush1.bf16.msra.mxu1 %v3456_v49  ;;  %v3510_v44 = vld [vmem:[#allocation8 + $0x268] ss:$16 sps:$4 sm:$0xff]   ;;  %v3521_v49 = vld [vmem:[#allocation8 + $0x2a4] ss:$16 sps:$4 sm:$0xff]  }
  0xca   :  { %2444 = vmatprep.subr.bf16.mxu1 %v3464_v50  ;;  %v3524_v50 = vld [vmem:[#allocation8 + $0x2ac] ss:$16 sps:$4 sm:$0xff]  }
  0xcc   :  { %2281 = vmatpush1.bf16.msra.mxu0 %v3459_v47  ;;  %v3513_v47 = vld [vmem:[#allocation8 + $0x280] ss:$16 sps:$4 sm:$0xff]  }
  0xcd   :  { %2282 = vmatprep.subr.bf16.mxu0 %v3467_v48  ;;  %2445 = vmatpush1.bf16.msra.mxu1 %v3462_v53  ;;  %v3516_v48 = vld [vmem:[#allocation8 + $0x288] ss:$16 sps:$4 sm:$0xff]   ;;  %v3527_v53 = vld [vmem:[#allocation8 + $0x2c4] ss:$16 sps:$4 sm:$0xff]  }
  0xce   :  { %2446 = vmatprep.subr.bf16.mxu1 %v3470_v54  ;;  %v3530_v54 = vld [vmem:[#allocation8 + $0x2cc] ss:$16 sps:$4 sm:$0xff]  }
  0xd0   :  { %2283 = vmatpush1.bf16.msra.mxu0 %v3465_v51  ;;  %v3519_v51 = vld [vmem:[#allocation8 + $0x2a0] ss:$16 sps:$4 sm:$0xff]  }
  0xd1   :  { %2284 = vmatprep.subr.bf16.mxu0 %v3473_v52  ;;  %2447 = vmatpush1.bf16.msra.mxu1 %v3468_v55  ;;  %v3522_v52 = vld [vmem:[#allocation8 + $0x2a8] ss:$16 sps:$4 sm:$0xff]   ;;  %v3525_v55 = vld [vmem:[#allocation8 + $0x2c0] ss:$16 sps:$4 sm:$0xff]  }
  0xd2   :  { %2448 = vmatprep.subr.bf16.mxu1 %v3476_v57  ;;  %v3533_v57 = vld [vmem:[#allocation8 + $0x2e4] ss:$16 sps:$4 sm:$0xff]  }
  0xd4   :  { %2285 = vmatpush1.bf16.msra.mxu0 %v3471_v56  ;;  %v3528_v56 = vld [vmem:[#allocation8 + $0x2c8] ss:$16 sps:$4 sm:$0xff]  }
  0xd5   :  { %2286 = vmatprep.subr.bf16.mxu0 %v3479_v58  ;;  %2449 = vmatpush1.bf16.msra.mxu1 %v3474_v59  ;;  %v3536_v58 = vld [vmem:[#allocation8 + $0x2ec] ss:$16 sps:$4 sm:$0xff]  }
  0xd6   :  { %2450 = vmatprep.subr.bf16.mxu1 %v3482_v61  ;;  %v3531_v61 = vld [vmem:[#allocation8 + $0x2e0] ss:$16 sps:$4 sm:$0xff]  }
  0xd8   :  { %2287 = vmatpush1.bf16.msra.mxu0 %v3477_v60 }
  0xd9   :  { %2288 = vmatprep.subr.bf16.mxu0 %v3485_v62  ;;  %2451 = vmatpush1.bf16.msra.mxu1 %v3480_v63  ;;  %v3534_v62 = vld [vmem:[#allocation8 + $0x2e8] ss:$16 sps:$4 sm:$0xff]  }
  0xda   :  { %2452 = vmatprep.subr.bf16.mxu1 %v3488_v2  ;;  %v3542_v2 = vld [vmem:[#allocation8 + $0x30c] ss:$16 sps:$4 sm:$0xff]  }
  0xdc   :  { %2289 = vmatpush1.bf16.msra.mxu0 %v3483_v1  ;;  %v3539_v1 = vld [vmem:[#allocation8 + $0x304] ss:$16 sps:$4 sm:$0xff]  }
  0xdd   :  { %2299 = vmatprep.subr.bf16.mxu0 %v3491_v3  ;;  %2453 = vmatpush1.bf16.msra.mxu1 %v3486_v4  ;;  %v3537_v4 = vld [vmem:[#allocation8 + $0x300] ss:$16 sps:$4 sm:$0xff]  }
  0xde   :  { %2463 = vmatprep.subr.bf16.mxu1 %v3494_v5  ;;  %v3540_v5 = vld [vmem:[#allocation8 + $0x308] ss:$16 sps:$4 sm:$0xff]  }
 0x152   :  { %v554_v14 = vpop.f32.mrb[0].mxu0  ;;  %v4088_v26 = vpop.f32.mrb[0].mxu1 }
 0x153   :  { %v555_v16 = vadd.f32 %v554_v14, %v163_v12  ;;  %v556_v17 = vpop.f32.mrb[1].mxu0  ;;  %v597_v30 = vpop.f32.mrb[1].mxu1  ;;  %v3545_v12 = vld [vmem:[#allocation8 + $0x324] ss:$16 sps:$4 sm:$0xff]  }
 0x154   :  { %v557_v18 = vadd.f32 %v556_v17, %v167_v13  ;;  %v558_v19 = vpop.f32.mrb[2].mxu0  ;;  %v598_v31 = vadd.f32 %v597_v30, %v175_v23  ;;  %v599_v32 = vpop.f32.mrb[2].mxu1  ;;  %v3548_v13 = vld [vmem:[#allocation8 + $0x32c] ss:$16 sps:$4 sm:$0xff]   ;;  %v3552_v23 = vld [vmem:[#allocation8 + $0x348] ss:$16 sps:$4 sm:$0xff]  }
 0x155   :  { %v684_v20 = vmax.f32 %v555_v16, 0.0  ;;  %v559_v21 = vpop.f32.mrb[3].mxu0  ;;  %v600_v33 = vpop.f32.mrb[3].mxu1  ;;  %v3546_v19 = vld [vmem:[#allocation8 + $0x328] ss:$16 sps:$4 sm:$0xff]   ;;  %v170_v30 = vsub.s32 2, %v4072_v8 }
 0x156   :  { %v685_v22 = vmax.f32 %v557_v18, 0.0  ;;  %v687_v36 = vmax.f32 %v598_v31, 0.0  ;;  %v3543_v18 = vld [vmem:[#allocation8 + $0x320] ss:$16 sps:$4 sm:$0xff]   ;;  %v3554_v21 = vld [vmem:[#allocation8 + $0x34c] ss:$16 sps:$4 sm:$0xff]  }
 0x157   :  { %v692_v27 = vpack.c.bf16 %v684_v20, %v684_v20  ;;  %v3551_v20 = vld [vmem:[#allocation8 + $0x344] ss:$16 sps:$4 sm:$0xff]   ;;  %v3561_v31 = vld [vmem:[#allocation8 + $0x380] ss:$16 sps:$4 sm:$0xff]   ;;  %v3564_v32 = vld [vmem:[#allocation8 + $0x388] ss:$16 sps:$4 sm:$0xff]  }
 0x158   :  { %v693_v24 = vpack.c.bf16 %v685_v22, %v685_v22  ;;  %v695_v39 = vpack.c.bf16 %v687_v36, %v687_v36  ;;  %v3549_v22 = vld [vmem:[#allocation8 + $0x340] ss:$16 sps:$4 sm:$0xff]   ;;  %v3569_v33 = vld [vmem:[#allocation8 + $0x3a4] ss:$16 sps:$4 sm:$0xff]   ;;  %v171_v36 = vrot.slane %v4075_v10, %v170_v30 }
 0x15a   :  { %2290 = vmatprep.mubr.bf16.mxu0 %v693_v24  ;;  %2454 = vmatprep.mubr.bf16.mxu1 %v693_v24  ;;  %v3557_v24 = vld [vmem:[#allocation8 + $0x364] ss:$16 sps:$4 sm:$0xff]  }
 0x15b   :  { %2291 = vmatmul.mubr.bf16.vlgmr.msra.gmra.mrb[8].mxu0 %v692_v27  ;;  %2455 = vmatmul.mubr.bf16.vlgmr.msra.gmra.mrb[8].mxu1 %v692_v27  ;;  %v3558_v27 = vld [vmem:[#allocation8 + $0x368] ss:$16 sps:$4 sm:$0xff]  }
 0x15c   :  { %2300 = vmatpush1.bf16.msra.mxu0 %v3489_v6  ;;  %2464 = vmatpush1.bf16.msra.mxu1 %v3492_v25  ;;  %v3560_v6 = vld [vmem:[#allocation8 + $0x36c] ss:$16 sps:$4 sm:$0xff]   ;;  %v3555_v25 = vld [vmem:[#allocation8 + $0x360] ss:$16 sps:$4 sm:$0xff]  }
 0x15d   :  { %2301 = vmatprep.subr.bf16.mxu0 %v3497_v28  ;;  %2465 = vmatprep.subr.bf16.mxu1 %v3500_v29  ;;  %v3563_v28 = vld [vmem:[#allocation8 + $0x384] ss:$16 sps:$4 sm:$0xff]   ;;  %v3566_v29 = vld [vmem:[#allocation8 + $0x38c] ss:$16 sps:$4 sm:$0xff]  }
 0x15e   :  { %2331 = vmatprep.mubr.bf16.mxu0 %v695_v39  ;;  %2495 = vmatprep.mubr.bf16.mxu1 %v695_v39  ;;  %v3575_v39 = vld [vmem:[#allocation8 + $0x3c4] ss:$16 sps:$4 sm:$0xff]  }
 0x160   :  { %2302 = vmatpush1.bf16.msra.mxu0 %v3495_v34  ;;  %2466 = vmatpush1.bf16.msra.mxu1 %v3498_v35  ;;  %v3572_v34 = vld [vmem:[#allocation8 + $0x3ac] ss:$16 sps:$4 sm:$0xff]   ;;  %v182_v35 = vsub.s32 5, %v4072_v8 }
 0x161   :  { %2303 = vmatprep.subr.bf16.mxu0 %v3503_v37  ;;  %2467 = vmatprep.subr.bf16.mxu1 %v3506_v38  ;;  %v3567_v37 = vld [vmem:[#allocation8 + $0x3a0] ss:$16 sps:$4 sm:$0xff]   ;;  %v3570_v38 = vld [vmem:[#allocation8 + $0x3a8] ss:$16 sps:$4 sm:$0xff]  }
 0x164   :  { %2304 = vmatpush1.bf16.msra.mxu0 %v3501_v40  ;;  %2468 = vmatpush1.bf16.msra.mxu1 %v3504_v41  ;;  %v3578_v40 = vld [vmem:[#allocation8 + $0x3cc] ss:$16 sps:$4 sm:$0xff]   ;;  %v183_v41 = vrot.slane %v4075_v10, %v182_v35  ;;  %v3641_v35 = vld [vmem:[#allocation8 + $0x524] ss:$16 sps:$4 sm:$0xff]  }
 0x165   :  { %2305 = vmatprep.subr.bf16.mxu0 %v3509_v42  ;;  %2469 = vmatprep.subr.bf16.mxu1 %v3512_v0  ;;  %v596_v42 = vadd.f32 %v4088_v26, %v171_v36  ;;  %v3573_v0 = vld [vmem:[#allocation8 + $0x3c0] ss:$16 sps:$4 sm:$0xff]   ;;  %v3644_v36 = vld [vmem:[#allocation8 + $0x52c] ss:$16 sps:$4 sm:$0xff]  }
 0x168   :  { %2306 = vmatpush1.bf16.msra.mxu0 %v3507_v43  ;;  %2470 = vmatpush1.bf16.msra.mxu1 %v3510_v44  ;;  %v3576_v43 = vld [vmem:[#allocation8 + $0x3c8] ss:$16 sps:$4 sm:$0xff]   ;;  %v3581_v44 = vld [vmem:[#allocation8 + $0x3e4] ss:$16 sps:$4 sm:$0xff]  }
 0x169   :  { %2307 = vmatprep.subr.bf16.mxu0 %v3515_v45  ;;  %2471 = vmatprep.subr.bf16.mxu1 %v3518_v46  ;;  %v3584_v45 = vld [vmem:[#allocation8 + $0x3ec] ss:$16 sps:$4 sm:$0xff]  }
 0x16c   :  { %2308 = vmatpush1.bf16.msra.mxu0 %v3513_v47  ;;  %2472 = vmatpush1.bf16.msra.mxu1 %v3516_v48  ;;  %v686_v47 = vmax.f32 %v596_v42, 0.0  ;;  %v3579_v48 = vld [vmem:[#allocation8 + $0x3e0] ss:$16 sps:$4 sm:$0xff]   ;;  %v3648_v42 = vld [vmem:[#allocation8 + $0x548] ss:$16 sps:$4 sm:$0xff]  }
 0x16d   :  { %2309 = vmatprep.subr.bf16.mxu0 %v3521_v49  ;;  %2473 = vmatprep.subr.bf16.mxu1 %v3524_v50  ;;  %v3582_v49 = vld [vmem:[#allocation8 + $0x3e8] ss:$16 sps:$4 sm:$0xff]   ;;  %v3587_v50 = vld [vmem:[#allocation8 + $0x404] ss:$16 sps:$4 sm:$0xff]  }
 0x170   :  { %2310 = vmatpush1.bf16.msra.mxu0 %v3519_v51  ;;  %2474 = vmatpush1.bf16.msra.mxu1 %v3522_v52  ;;  %v3590_v51 = vld [vmem:[#allocation8 + $0x40c] ss:$16 sps:$4 sm:$0xff]   ;;  %v694_v52 = vpack.c.bf16 %v686_v47, %v686_v47 }
 0x171   :  { %2311 = vmatprep.subr.bf16.mxu0 %v3527_v53  ;;  %2475 = vmatprep.subr.bf16.mxu1 %v3530_v54  ;;  %v3585_v53 = vld [vmem:[#allocation8 + $0x400] ss:$16 sps:$4 sm:$0xff]   ;;  %v3588_v54 = vld [vmem:[#allocation8 + $0x408] ss:$16 sps:$4 sm:$0xff]   ;;  %v3662_v47 = vld [vmem:[#allocation8 + $0x58c] ss:$16 sps:$4 sm:$0xff]  }
 0x172   :  { %v4090_v59 = vpop.f32.mrb[4].mxu0 }
 0x173   :  { %v4092_v60 = vpop.f32.mrb[5].mxu0  ;;  %v4094_v7 = vpop.f32.mrb[4].mxu1 }
 0x174   :  { %2312 = vmatpush1.bf16.msra.mxu0 %v3525_v55  ;;  %2476 = vmatpush1.bf16.msra.mxu1 %v3528_v56  ;;  %v640_v63 = vpop.f32.mrb[6].mxu0  ;;  %v4096_v14 = vpop.f32.mrb[5].mxu1  ;;  %v639_v46 = vadd.f32 %v4092_v60, %v183_v41  ;;  %v3593_v55 = vld [vmem:[#allocation8 + $0x424] ss:$16 sps:$4 sm:$0xff]   ;;  %v3596_v56 = vld [vmem:[#allocation8 + $0x42c] ss:$16 sps:$4 sm:$0xff]  }
 0x175   :  { %2313 = vmatprep.subr.bf16.mxu0 %v3533_v57  ;;  %2477 = vmatprep.subr.bf16.mxu1 %v3536_v58  ;;  %v641_v3 = vpop.f32.mrb[7].mxu0  ;;  %v681_v16 = vpop.f32.mrb[6].mxu1  ;;  %v3591_v58 = vld [vmem:[#allocation8 + $0x420] ss:$16 sps:$4 sm:$0xff]   ;;  %v3594_v60 = vld [vmem:[#allocation8 + $0x428] ss:$16 sps:$4 sm:$0xff]  }
 0x176   :  { %v682_v17 = vpop.f32.mrb[7].mxu1  ;;  %v689_v26 = vmax.f32 %v639_v46, 0.0  ;;  %v3597_v63 = vld [vmem:[#allocation8 + $0x440] ss:$16 sps:$4 sm:$0xff]   ;;  %v3608_v3 = vld [vmem:[#allocation8 + $0x46c] ss:$16 sps:$4 sm:$0xff]  }
 0x177   :  { %v3609_v16 = vld [vmem:[#allocation8 + $0x480] ss:$16 sps:$4 sm:$0xff]   ;;  %v3612_v17 = vld [vmem:[#allocation8 + $0x488] ss:$16 sps:$4 sm:$0xff]   ;;  %v3659_v46 = vld [vmem:[#allocation8 + $0x584] ss:$16 sps:$4 sm:$0xff]  }
 0x178   :  { %2314 = vmatpush1.bf16.msra.mxu0 %v3531_v61  ;;  %2478 = vmatpush1.bf16.msra.mxu1 %v3534_v62  ;;  %v697_v57 = vpack.c.bf16 %v689_v26, %v689_v26  ;;  %v3599_v61 = vld [vmem:[#allocation8 + $0x444] ss:$16 sps:$4 sm:$0xff]   ;;  %v3602_v62 = vld [vmem:[#allocation8 + $0x44c] ss:$16 sps:$4 sm:$0xff]   ;;  %v3645_v41 = vld [vmem:[#allocation8 + $0x540] ss:$16 sps:$4 sm:$0xff]  }
 0x179   :  { %2315 = vmatprep.subr.bf16.mxu0 %v3539_v1  ;;  %2479 = vmatprep.subr.bf16.mxu1 %v3542_v2  ;;  %v3600_v1 = vld [vmem:[#allocation8 + $0x448] ss:$16 sps:$4 sm:$0xff]   ;;  %v3605_v2 = vld [vmem:[#allocation8 + $0x464] ss:$16 sps:$4 sm:$0xff]   ;;  %v3668_v26 = vld [vmem:[#allocation8 + $0x5ac] ss:$16 sps:$4 sm:$0xff]  }
 0x17c   :  { %2316 = vmatpush1.bf16.msra.mxu0 %v3537_v4  ;;  %2480 = vmatpush1.bf16.msra.mxu1 %v3540_v5  ;;  %v3603_v4 = vld [vmem:[#allocation8 + $0x460] ss:$16 sps:$4 sm:$0xff]   ;;  %v3606_v5 = vld [vmem:[#allocation8 + $0x468] ss:$16 sps:$4 sm:$0xff]  }
 0x17d   :  { %2317 = vmatprep.subr.bf16.mxu0 %v3545_v12  ;;  %2481 = vmatprep.subr.bf16.mxu1 %v3548_v13  ;;  %v3611_v12 = vld [vmem:[#allocation8 + $0x484] ss:$16 sps:$4 sm:$0xff]   ;;  %v3614_v13 = vld [vmem:[#allocation8 + $0x48c] ss:$16 sps:$4 sm:$0xff]  }
 0x180   :  { %2318 = vmatpush1.bf16.msra.mxu0 %v3543_v18  ;;  %2482 = vmatpush1.bf16.msra.mxu1 %v3546_v19  ;;  %v3617_v18 = vld [vmem:[#allocation8 + $0x4a4] ss:$16 sps:$4 sm:$0xff]   ;;  %v3620_v19 = vld [vmem:[#allocation8 + $0x4ac] ss:$16 sps:$4 sm:$0xff]  }
 0x181   :  { %2319 = vmatprep.subr.bf16.mxu0 %v3551_v20  ;;  %2483 = vmatprep.subr.bf16.mxu1 %v3554_v21  ;;  %v3615_v20 = vld [vmem:[#allocation8 + $0x4a0] ss:$16 sps:$4 sm:$0xff]   ;;  %v3618_v21 = vld [vmem:[#allocation8 + $0x4a8] ss:$16 sps:$4 sm:$0xff]  }
 0x184   :  { %2320 = vmatpush1.bf16.msra.mxu0 %v3549_v22  ;;  %2484 = vmatpush1.bf16.msra.mxu1 %v3552_v23  ;;  %v3623_v22 = vld [vmem:[#allocation8 + $0x4c4] ss:$16 sps:$4 sm:$0xff]   ;;  %v3626_v23 = vld [vmem:[#allocation8 + $0x4cc] ss:$16 sps:$4 sm:$0xff]  }
 0x185   :  { %2321 = vmatprep.subr.bf16.mxu0 %v3557_v24  ;;  %2485 = vmatprep.subr.bf16.mxu1 %v3560_v6  ;;  %v3621_v24 = vld [vmem:[#allocation8 + $0x4c0] ss:$16 sps:$4 sm:$0xff]   ;;  %v3624_v6 = vld [vmem:[#allocation8 + $0x4c8] ss:$16 sps:$4 sm:$0xff]  }
 0x188   :  { %2322 = vmatpush1.bf16.msra.mxu0 %v3555_v25  ;;  %2486 = vmatpush1.bf16.msra.mxu1 %v3558_v27  ;;  %v3629_v25 = vld [vmem:[#allocation8 + $0x4e4] ss:$16 sps:$4 sm:$0xff]   ;;  %v3632_v27 = vld [vmem:[#allocation8 + $0x4ec] ss:$16 sps:$4 sm:$0xff]  }
 0x189   :  { %2323 = vmatprep.subr.bf16.mxu0 %v3563_v28  ;;  %2487 = vmatprep.subr.bf16.mxu1 %v3566_v29  ;;  %v3627_v28 = vld [vmem:[#allocation8 + $0x4e0] ss:$16 sps:$4 sm:$0xff]   ;;  %v3630_v29 = vld [vmem:[#allocation8 + $0x4e8] ss:$16 sps:$4 sm:$0xff]  }
 0x18c   :  { %2324 = vmatpush1.bf16.msra.mxu0 %v3561_v31  ;;  %2488 = vmatpush1.bf16.msra.mxu1 %v3564_v32  ;;  %v3635_v31 = vld [vmem:[#allocation8 + $0x504] ss:$16 sps:$4 sm:$0xff]   ;;  %v3638_v32 = vld [vmem:[#allocation8 + $0x50c] ss:$16 sps:$4 sm:$0xff]  }
 0x18d   :  { %2325 = vmatprep.subr.bf16.mxu0 %v3569_v33  ;;  %2489 = vmatprep.subr.bf16.mxu1 %v3572_v34  ;;  %v3633_v33 = vld [vmem:[#allocation8 + $0x500] ss:$16 sps:$4 sm:$0xff]   ;;  %v3636_v34 = vld [vmem:[#allocation8 + $0x508] ss:$16 sps:$4 sm:$0xff]  }
 0x190   :  { %2326 = vmatpush1.bf16.msra.mxu0 %v3567_v37  ;;  %2490 = vmatpush1.bf16.msra.mxu1 %v3570_v38  ;;  %v3639_v37 = vld [vmem:[#allocation8 + $0x520] ss:$16 sps:$4 sm:$0xff]   ;;  %v3642_v38 = vld [vmem:[#allocation8 + $0x528] ss:$16 sps:$4 sm:$0xff]  }
 0x191   :  { %2327 = vmatprep.subr.bf16.mxu0 %v3575_v39  ;;  %2491 = vmatprep.subr.bf16.mxu1 %v3578_v40  ;;  %v3647_v39 = vld [vmem:[#allocation8 + $0x544] ss:$16 sps:$4 sm:$0xff]   ;;  %v3650_v40 = vld [vmem:[#allocation8 + $0x54c] ss:$16 sps:$4 sm:$0xff]  }
 0x194   :  { %2328 = vmatpush1.bf16.msra.mxu0 %v3573_v0  ;;  %2492 = vmatpush1.bf16.msra.mxu1 %v3576_v43  ;;  %v3653_v0 = vld [vmem:[#allocation8 + $0x564] ss:$16 sps:$4 sm:$0xff]   ;;  %v3656_v43 = vld [vmem:[#allocation8 + $0x56c] ss:$16 sps:$4 sm:$0xff]  }
 0x195   :  { %2329 = vmatprep.subr.bf16.mxu0 %v3581_v44  ;;  %2493 = vmatprep.subr.bf16.mxu1 %v3584_v45  ;;  %v3651_v44 = vld [vmem:[#allocation8 + $0x560] ss:$16 sps:$4 sm:$0xff]   ;;  %v3654_v45 = vld [vmem:[#allocation8 + $0x568] ss:$16 sps:$4 sm:$0xff]  }
 0x198   :  { %2330 = vmatpush1.bf16.msra.mxu0 %v3579_v48  ;;  %2494 = vmatpush1.bf16.msra.mxu1 %v3582_v49  ;;  %v178_v48 = vsub.s32 4, %v4072_v8  ;;  %v3657_v49 = vld [vmem:[#allocation8 + $0x580] ss:$16 sps:$4 sm:$0xff]  }
 0x199   :  { %2340 = vmatprep.subr.bf16.mxu0 %v3587_v50  ;;  %2504 = vmatprep.subr.bf16.mxu1 %v3590_v51  ;;  %v3660_v50 = vld [vmem:[#allocation8 + $0x588] ss:$16 sps:$4 sm:$0xff]   ;;  %v3665_v51 = vld [vmem:[#allocation8 + $0x5a4] ss:$16 sps:$4 sm:$0xff]  }
 0x19b   :  { %2332 = vmatmul.mubr.bf16.vlgmr.msra.gmra.mrb[8].mxu0 %v694_v52  ;;  %2496 = vmatmul.mubr.bf16.vlgmr.msra.gmra.mrb[8].mxu1 %v694_v52  ;;  %v190_v52 = vsub.s32 7, %v4072_v8 }
 0x19c   :  { %2341 = vmatpush1.bf16.msra.mxu0 %v3585_v53  ;;  %2505 = vmatpush1.bf16.msra.mxu1 %v3588_v54  ;;  %v179_v53 = vrot.slane %v4075_v10, %v178_v48  ;;  %v3663_v54 = vld [vmem:[#allocation8 + $0x5a0] ss:$16 sps:$4 sm:$0xff]   ;;  %v3734_v48 = vld [vmem:[#allocation8 + $0x70c] ss:$16 sps:$4 sm:$0xff]  }
 0x19d   :  { %2342 = vmatprep.subr.bf16.mxu0 %v3593_v55  ;;  %2506 = vmatprep.subr.bf16.mxu1 %v3596_v56  ;;  %v3666_v55 = vld [vmem:[#allocation8 + $0x5a8] ss:$16 sps:$4 sm:$0xff]   ;;  %v3671_v56 = vld [vmem:[#allocation8 + $0x5c4] ss:$16 sps:$4 sm:$0xff]  }
 0x19e   :  { %2372 = vmatprep.mubr.bf16.mxu0 %v697_v57  ;;  %2536 = vmatprep.mubr.bf16.mxu1 %v697_v57  ;;  %v3674_v57 = vld [vmem:[#allocation8 + $0x5cc] ss:$16 sps:$4 sm:$0xff]  }
 0x1a0   :  { %2343 = vmatpush1.bf16.msra.mxu0 %v3591_v58  ;;  %2507 = vmatpush1.bf16.msra.mxu1 %v3594_v60  ;;  %v191_v58 = vrot.slane %v4075_v10, %v190_v52  ;;  %v637_v60 = vadd.f32 %v4090_v59, %v179_v53  ;;  %v3735_v52 = vld [vmem:[#allocation8 + $0x720] ss:$16 sps:$4 sm:$0xff]   ;;  %v3738_v53 = vld [vmem:[#allocation8 + $0x728] ss:$16 sps:$4 sm:$0xff]  }
 0x1a1   :  { %2344 = vmatprep.subr.bf16.mxu0 %v3599_v61  ;;  %2508 = vmatprep.subr.bf16.mxu1 %v3602_v62  ;;  %v3669_v61 = vld [vmem:[#allocation8 + $0x5c0] ss:$16 sps:$4 sm:$0xff]   ;;  %v3672_v62 = vld [vmem:[#allocation8 + $0x5c8] ss:$16 sps:$4 sm:$0xff]  }
 0x1a4   :  { %2345 = vmatpush1.bf16.msra.mxu0 %v3597_v63  ;;  %2509 = vmatpush1.bf16.msra.mxu1 %v3600_v1  ;;  %v3677_v63 = vld [vmem:[#allocation8 + $0x5e4] ss:$16 sps:$4 sm:$0xff]   ;;  %v3680_v1 = vld [vmem:[#allocation8 + $0x5ec] ss:$16 sps:$4 sm:$0xff]  }
 0x1a5   :  { %2346 = vmatprep.subr.bf16.mxu0 %v3605_v2  ;;  %2510 = vmatprep.subr.bf16.mxu1 %v3608_v3  ;;  %v680_v2 = vadd.f32 %v4096_v14, %v191_v58  ;;  %v688_v3 = vmax.f32 %v637_v60, 0.0  ;;  %v3749_v58 = vld [vmem:[#allocation8 + $0x764] ss:$16 sps:$4 sm:$0xff]   ;;  %v3752_v60 = vld [vmem:[#allocation8 + $0x76c] ss:$16 sps:$4 sm:$0xff]  }
 0x1a7   :  { %v691_v59 = vmax.f32 %v680_v2, 0.0  ;;  %v3753_v2 = vld [vmem:[#allocation8 + $0x780] ss:$16 sps:$4 sm:$0xff]  }
 0x1a8   :  { %2347 = vmatpush1.bf16.msra.mxu0 %v3603_v4  ;;  %2511 = vmatpush1.bf16.msra.mxu1 %v3606_v5  ;;  %v3675_v4 = vld [vmem:[#allocation8 + $0x5e0] ss:$16 sps:$4 sm:$0xff]   ;;  %v3678_v5 = vld [vmem:[#allocation8 + $0x5e8] ss:$16 sps:$4 sm:$0xff]  }
 0x1a9   :  { %2348 = vmatprep.subr.bf16.mxu0 %v3611_v12  ;;  %2512 = vmatprep.subr.bf16.mxu1 %v3614_v13  ;;  %v3683_v12 = vld [vmem:[#allocation8 + $0x604] ss:$16 sps:$4 sm:$0xff]   ;;  %v3686_v13 = vld [vmem:[#allocation8 + $0x60c] ss:$16 sps:$4 sm:$0xff]   ;;  %v699_v14 = vpack.c.bf16 %v691_v59, %v691_v59  ;;  %v3762_v59 = vld [vmem:[#allocation8 + $0x7a8] ss:$16 sps:$4 sm:$0xff]  }
 0x1ac   :  { %2349 = vmatpush1.bf16.msra.mxu0 %v3609_v16  ;;  %2513 = vmatpush1.bf16.msra.mxu1 %v3612_v17  ;;  %v696_v16 = vpack.c.bf16 %v688_v3, %v688_v3  ;;  %v3681_v17 = vld [vmem:[#allocation8 + $0x600] ss:$16 sps:$4 sm:$0xff]   ;;  %v3756_v3 = vld [vmem:[#allocation8 + $0x788] ss:$16 sps:$4 sm:$0xff]  }
 0x1ad   :  { %2350 = vmatprep.subr.bf16.mxu0 %v3617_v18  ;;  %2514 = vmatprep.subr.bf16.mxu1 %v3620_v19  ;;  %v3684_v18 = vld [vmem:[#allocation8 + $0x608] ss:$16 sps:$4 sm:$0xff]   ;;  %v3689_v19 = vld [vmem:[#allocation8 + $0x624] ss:$16 sps:$4 sm:$0xff]  }
 0x1b0   :  { %2351 = vmatpush1.bf16.msra.mxu0 %v3615_v20  ;;  %2515 = vmatpush1.bf16.msra.mxu1 %v3618_v21  ;;  %v3692_v20 = vld [vmem:[#allocation8 + $0x62c] ss:$16 sps:$4 sm:$0xff]   ;;  %v3687_v21 = vld [vmem:[#allocation8 + $0x620] ss:$16 sps:$4 sm:$0xff]  }
 0x1b1   :  { %2352 = vmatprep.subr.bf16.mxu0 %v3623_v22  ;;  %2516 = vmatprep.subr.bf16.mxu1 %v3626_v23  ;;  %v3690_v22 = vld [vmem:[#allocation8 + $0x628] ss:$16 sps:$4 sm:$0xff]   ;;  %v3695_v23 = vld [vmem:[#allocation8 + $0x644] ss:$16 sps:$4 sm:$0xff]  }
 0x1b4   :  { %2353 = vmatpush1.bf16.msra.mxu0 %v3621_v24  ;;  %2517 = vmatpush1.bf16.msra.mxu1 %v3624_v6  ;;  %v3698_v24 = vld [vmem:[#allocation8 + $0x64c] ss:$16 sps:$4 sm:$0xff]   ;;  %v3693_v6 = vld [vmem:[#allocation8 + $0x640] ss:$16 sps:$4 sm:$0xff]  }
 0x1b5   :  { %2354 = vmatprep.subr.bf16.mxu0 %v3629_v25  ;;  %2518 = vmatprep.subr.bf16.mxu1 %v3632_v27  ;;  %v3696_v25 = vld [vmem:[#allocation8 + $0x648] ss:$16 sps:$4 sm:$0xff]   ;;  %v3701_v27 = vld [vmem:[#allocation8 + $0x664] ss:$16 sps:$4 sm:$0xff]  }
 0x1b8   :  { %2355 = vmatpush1.bf16.msra.mxu0 %v3627_v28  ;;  %2519 = vmatpush1.bf16.msra.mxu1 %v3630_v29  ;;  %v3704_v28 = vld [vmem:[#allocation8 + $0x66c] ss:$16 sps:$4 sm:$0xff]   ;;  %v3699_v29 = vld [vmem:[#allocation8 + $0x660] ss:$16 sps:$4 sm:$0xff]  }
 0x1b9   :  { %2356 = vmatprep.subr.bf16.mxu0 %v3635_v31  ;;  %2520 = vmatprep.subr.bf16.mxu1 %v3638_v32  ;;  %v3702_v31 = vld [vmem:[#allocation8 + $0x668] ss:$16 sps:$4 sm:$0xff]   ;;  %v3707_v32 = vld [vmem:[#allocation8 + $0x684] ss:$16 sps:$4 sm:$0xff]  }
 0x1bc   :  { %2357 = vmatpush1.bf16.msra.mxu0 %v3633_v33  ;;  %2521 = vmatpush1.bf16.msra.mxu1 %v3636_v34  ;;  %v3710_v33 = vld [vmem:[#allocation8 + $0x68c] ss:$16 sps:$4 sm:$0xff]   ;;  %v3705_v34 = vld [vmem:[#allocation8 + $0x680] ss:$16 sps:$4 sm:$0xff]  }
 0x1bd   :  { %2358 = vmatprep.subr.bf16.mxu0 %v3641_v35  ;;  %2522 = vmatprep.subr.bf16.mxu1 %v3644_v36  ;;  %v3708_v35 = vld [vmem:[#allocation8 + $0x688] ss:$16 sps:$4 sm:$0xff]   ;;  %v3713_v36 = vld [vmem:[#allocation8 + $0x6a4] ss:$16 sps:$4 sm:$0xff]  }
 0x1c0   :  { %2359 = vmatpush1.bf16.msra.mxu0 %v3639_v37  ;;  %2523 = vmatpush1.bf16.msra.mxu1 %v3642_v38  ;;  %v3716_v37 = vld [vmem:[#allocation8 + $0x6ac] ss:$16 sps:$4 sm:$0xff]   ;;  %v3711_v38 = vld [vmem:[#allocation8 + $0x6a0] ss:$16 sps:$4 sm:$0xff]  }
 0x1c1   :  { %2360 = vmatprep.subr.bf16.mxu0 %v3647_v39  ;;  %2524 = vmatprep.subr.bf16.mxu1 %v3650_v40  ;;  %v3714_v39 = vld [vmem:[#allocation8 + $0x6a8] ss:$16 sps:$4 sm:$0xff]   ;;  %v3719_v40 = vld [vmem:[#allocation8 + $0x6c4] ss:$16 sps:$4 sm:$0xff]  }
 0x1c4   :  { %2361 = vmatpush1.bf16.msra.mxu0 %v3645_v41  ;;  %2525 = vmatpush1.bf16.msra.mxu1 %v3648_v42  ;;  %v3722_v41 = vld [vmem:[#allocation8 + $0x6cc] ss:$16 sps:$4 sm:$0xff]   ;;  %v3717_v42 = vld [vmem:[#allocation8 + $0x6c0] ss:$16 sps:$4 sm:$0xff]  }
 0x1c5   :  { %2362 = vmatprep.subr.bf16.mxu0 %v3653_v0  ;;  %2526 = vmatprep.subr.bf16.mxu1 %v3656_v43  ;;  %v3720_v0 = vld [vmem:[#allocation8 + $0x6c8] ss:$16 sps:$4 sm:$0xff]   ;;  %v3725_v43 = vld [vmem:[#allocation8 + $0x6e4] ss:$16 sps:$4 sm:$0xff]  }
 0x1c8   :  { %2363 = vmatpush1.bf16.msra.mxu0 %v3651_v44  ;;  %2527 = vmatpush1.bf16.msra.mxu1 %v3654_v45  ;;  %v3728_v44 = vld [vmem:[#allocation8 + $0x6ec] ss:$16 sps:$4 sm:$0xff]   ;;  %v3723_v45 = vld [vmem:[#allocation8 + $0x6e0] ss:$16 sps:$4 sm:$0xff]  }
 0x1c9   :  { %2364 = vmatprep.subr.bf16.mxu0 %v3659_v46  ;;  %2528 = vmatprep.subr.bf16.mxu1 %v3662_v47  ;;  %v3726_v46 = vld [vmem:[#allocation8 + $0x6e8] ss:$16 sps:$4 sm:$0xff]   ;;  %v3731_v47 = vld [vmem:[#allocation8 + $0x704] ss:$16 sps:$4 sm:$0xff]  }
 0x1cc   :  { %2365 = vmatpush1.bf16.msra.mxu0 %v3657_v49  ;;  %2529 = vmatpush1.bf16.msra.mxu1 %v3660_v50  ;;  %v3729_v49 = vld [vmem:[#allocation8 + $0x700] ss:$16 sps:$4 sm:$0xff]   ;;  %v3732_v50 = vld [vmem:[#allocation8 + $0x708] ss:$16 sps:$4 sm:$0xff]  }
 0x1cd   :  { %2366 = vmatprep.subr.bf16.mxu0 %v3665_v51  ;;  %2530 = vmatprep.subr.bf16.mxu1 %v3668_v26  ;;  %v3737_v51 = vld [vmem:[#allocation8 + $0x724] ss:$16 sps:$4 sm:$0xff]   ;;  %v3740_v26 = vld [vmem:[#allocation8 + $0x72c] ss:$16 sps:$4 sm:$0xff]  }
 0x1d0   :  { %2367 = vmatpush1.bf16.msra.mxu0 %v3663_v54  ;;  %2531 = vmatpush1.bf16.msra.mxu1 %v3666_v55  ;;  %v3743_v54 = vld [vmem:[#allocation8 + $0x744] ss:$16 sps:$4 sm:$0xff]   ;;  %v3746_v55 = vld [vmem:[#allocation8 + $0x74c] ss:$16 sps:$4 sm:$0xff]  }
 0x1d1   :  { %2368 = vmatprep.subr.bf16.mxu0 %v3671_v56  ;;  %2532 = vmatprep.subr.bf16.mxu1 %v3674_v57  ;;  %v3741_v56 = vld [vmem:[#allocation8 + $0x740] ss:$16 sps:$4 sm:$0xff]   ;;  %v3744_v57 = vld [vmem:[#allocation8 + $0x748] ss:$16 sps:$4 sm:$0xff]  }
 0x1d4   :  { %2369 = vmatpush1.bf16.msra.mxu0 %v3669_v61  ;;  %2533 = vmatpush1.bf16.msra.mxu1 %v3672_v62  ;;  %v3747_v61 = vld [vmem:[#allocation8 + $0x760] ss:$16 sps:$4 sm:$0xff]   ;;  %v3750_v62 = vld [vmem:[#allocation8 + $0x768] ss:$16 sps:$4 sm:$0xff]  }
 0x1d5   :  { %2370 = vmatprep.subr.bf16.mxu0 %v3677_v63  ;;  %2534 = vmatprep.subr.bf16.mxu1 %v3680_v1  ;;  %v3755_v63 = vld [vmem:[#allocation8 + $0x784] ss:$16 sps:$4 sm:$0xff]   ;;  %v3758_v1 = vld [vmem:[#allocation8 + $0x78c] ss:$16 sps:$4 sm:$0xff]  }
 0x1d8   :  { %2371 = vmatpush1.bf16.msra.mxu0 %v3675_v4  ;;  %2535 = vmatpush1.bf16.msra.mxu1 %v3678_v5  ;;  %v186_v4 = vsub.s32 6, %v4072_v8  ;;  %v3761_v5 = vld [vmem:[#allocation8 + $0x7a4] ss:$16 sps:$4 sm:$0xff]  }
 0x1d9   :  { %2381 = vmatprep.subr.bf16.mxu0 %v3683_v12  ;;  %2545 = vmatprep.subr.bf16.mxu1 %v3686_v13  ;;  %v3764_v12 = vld [vmem:[#allocation8 + $0x7ac] ss:$16 sps:$4 sm:$0xff]   ;;  %v3759_v13 = vld [vmem:[#allocation8 + $0x7a0] ss:$16 sps:$4 sm:$0xff]  }
 0x1db   :  { %2373 = vmatmul.mubr.bf16.vlgmr.msra.gmra.mrb[8].mxu0 %v696_v16  ;;  %2537 = vmatmul.mubr.bf16.vlgmr.msra.gmra.mrb[8].mxu1 %v696_v16  ;;  %v187_v16 = vrot.slane %v4075_v10, %v186_v4  ;;  %v3777_v10 = vld [vmem:[#allocation10 + $0x40] sm:$0xff]  }
 0x1dc   :  { %2382 = vmatpush1.bf16.msra.mxu0 %v3681_v17  ;;  %2546 = vmatpush1.bf16.msra.mxu1 %v3684_v18  ;;  %v3767_v17 = vld [vmem:[#allocation8 + $0x7c4] ss:$16 sps:$4 sm:$0xff]   ;;  %v3770_v18 = vld [vmem:[#allocation8 + $0x7cc] ss:$16 sps:$4 sm:$0xff]  }
 0x1dd   :  { %2383 = vmatprep.subr.bf16.mxu0 %v3689_v19  ;;  %2547 = vmatprep.subr.bf16.mxu1 %v3692_v20  ;;  %v3765_v19 = vld [vmem:[#allocation8 + $0x7c0] ss:$16 sps:$4 sm:$0xff]   ;;  %v3768_v20 = vld [vmem:[#allocation8 + $0x7c8] ss:$16 sps:$4 sm:$0xff]  }
 0x1de   :  { %2413 = vmatprep.mubr.bf16.mxu0 %v699_v14  ;;  %2577 = vmatprep.mubr.bf16.mxu1 %v699_v14  ;;  %v678_v14 = vadd.f32 %v4094_v7, %v187_v16  ;;  %v3781_v7 = vld [vmem:[#allocation10 + $0x48] sm:$0xff]  }
 0x1e0   :  { %2384 = vmatpush1.bf16.msra.mxu0 %v3687_v21  ;;  %2548 = vmatpush1.bf16.msra.mxu1 %v3690_v22  ;;  %v3773_v21 = vld [vmem:[#allocation8 + $0x7e4] ss:$16 sps:$4 sm:$0xff]   ;;  %v3776_v22 = vld [vmem:[#allocation8 + $0x7ec] ss:$16 sps:$4 sm:$0xff]  }
 0x1e1   :  { %2385 = vmatprep.subr.bf16.mxu0 %v3695_v23  ;;  %2549 = vmatprep.subr.bf16.mxu1 %v3698_v24  ;;  %v3771_v23 = vld [vmem:[#allocation8 + $0x7e0] ss:$16 sps:$4 sm:$0xff]   ;;  %v3774_v24 = vld [vmem:[#allocation8 + $0x7e8] ss:$16 sps:$4 sm:$0xff]  }
 0x1e4   :  { %2386 = vmatpush1.bf16.msra.mxu0 %v3693_v6  ;;  %2550 = vmatpush1.bf16.msra.mxu1 %v3696_v25  ;;  %v690_v6 = vmax.f32 %v678_v14, 0.0  ;;  %v3778_v25 = vld [vmem:[#allocation10 + $0xc0] sm:$0xff]  }
 0x1e5   :  { %2387 = vmatprep.subr.bf16.mxu0 %v3701_v27  ;;  %2551 = vmatprep.subr.bf16.mxu1 %v3704_v28  ;;  %v3779_v27 = vld [vmem:[#allocation10] sm:$0xff]  }
 0x1e6   :  { %v3780_v28 = vld [vmem:[#allocation10 + $0x80] sm:$0xff]  }
 0x1e8   :  { %2388 = vmatpush1.bf16.msra.mxu0 %v3699_v29  ;;  %2552 = vmatpush1.bf16.msra.mxu1 %v3702_v31  ;;  %v698_v29 = vpack.c.bf16 %v690_v6, %v690_v6  ;;  %v3782_v31 = vld [vmem:[#allocation10 + $0xc8] sm:$0xff]  }
 0x1e9   :  { %2389 = vmatprep.subr.bf16.mxu0 %v3707_v32  ;;  %2553 = vmatprep.subr.bf16.mxu1 %v3710_v33  ;;  %v3783_v32 = vld [vmem:[#allocation10 + $0x8] sm:$0xff]  }
 0x1ea   :  { %v3784_v33 = vld [vmem:[#allocation10 + $0x88] sm:$0xff]  }
 0x1ec   :  { %2390 = vmatpush1.bf16.msra.mxu0 %v3705_v34  ;;  %2554 = vmatpush1.bf16.msra.mxu1 %v3708_v35  ;;  %v3785_v34 = vld [vmem:[#allocation10 + $0x50] sm:$0xff]  }
 0x1ed   :  { %2391 = vmatprep.subr.bf16.mxu0 %v3713_v36  ;;  %2555 = vmatprep.subr.bf16.mxu1 %v3716_v37  ;;  %v3786_v35 = vld [vmem:[#allocation10 + $0xd0] sm:$0xff]  }
 0x1ee   :  { %v3787_v36 = vld [vmem:[#allocation10 + $0x10] sm:$0xff]  }
 0x1ef   :  { %v3788_v37 = vld [vmem:[#allocation10 + $0x90] sm:$0xff]  }
 0x1f0   :  { %2392 = vmatpush1.bf16.msra.mxu0 %v3711_v38  ;;  %2556 = vmatpush1.bf16.msra.mxu1 %v3714_v39  ;;  %v3789_v38 = vld [vmem:[#allocation10 + $0x58] sm:$0xff]  }
 0x1f1   :  { %2393 = vmatprep.subr.bf16.mxu0 %v3719_v40  ;;  %2557 = vmatprep.subr.bf16.mxu1 %v3722_v41  ;;  %v3790_v39 = vld [vmem:[#allocation10 + $0xd8] sm:$0xff]  }
 0x1f2   :  { %v3791_v40 = vld [vmem:[#allocation10 + $0x18] sm:$0xff]  }
 0x1f3   :  { %v3792_v41 = vld [vmem:[#allocation10 + $0x98] sm:$0xff]  }
 0x1f4   :  { %2394 = vmatpush1.bf16.msra.mxu0 %v3717_v42  ;;  %2558 = vmatpush1.bf16.msra.mxu1 %v3720_v0  ;;  %v3793_v42 = vld [vmem:[#allocation10 + $0x60] sm:$0xff]  }
 0x1f5   :  { %2395 = vmatprep.subr.bf16.mxu0 %v3725_v43  ;;  %2559 = vmatprep.subr.bf16.mxu1 %v3728_v44  ;;  %v3794_v0 = vld [vmem:[#allocation10 + $0xe0] sm:$0xff]  }
 0x1f6   :  { %v3795_v43 = vld [vmem:[#allocation10 + $0x20] sm:$0xff]  }
 0x1f7   :  { %v3796_v44 = vld [vmem:[#allocation10 + $0xa0] sm:$0xff]  }
 0x1f8   :  { %2396 = vmatpush1.bf16.msra.mxu0 %v3723_v45  ;;  %2560 = vmatpush1.bf16.msra.mxu1 %v3726_v46  ;;  %v3797_v45 = vld [vmem:[#allocation10 + $0x68] sm:$0xff]  }
 0x1f9   :  { %2397 = vmatprep.subr.bf16.mxu0 %v3731_v47  ;;  %2561 = vmatprep.subr.bf16.mxu1 %v3734_v48  ;;  %v3798_v46 = vld [vmem:[#allocation10 + $0xe8] sm:$0xff]  }
 0x1fa   :  { %v3799_v47 = vld [vmem:[#allocation10 + $0x28] sm:$0xff]  }
 0x1fb   :  { %v3800_v48 = vld [vmem:[#allocation10 + $0xa8] sm:$0xff]  }
 0x1fc   :  { %2398 = vmatpush1.bf16.msra.mxu0 %v3729_v49  ;;  %2562 = vmatpush1.bf16.msra.mxu1 %v3732_v50  ;;  %v3801_v49 = vld [vmem:[#allocation10 + $0x70] sm:$0xff]  }
 0x1fd   :  { %2399 = vmatprep.subr.bf16.mxu0 %v3737_v51  ;;  %2563 = vmatprep.subr.bf16.mxu1 %v3740_v26  ;;  %v3802_v50 = vld [vmem:[#allocation10 + $0xf0] sm:$0xff]  }
 0x1fe   :  { %v3803_v51 = vld [vmem:[#allocation10 + $0x30] sm:$0xff]  }
 0x1ff   :  { %v3804_v26 = vld [vmem:[#allocation10 + $0xb0] sm:$0xff]  }
 0x200   :  { %2400 = vmatpush1.bf16.msra.mxu0 %v3735_v52  ;;  %2564 = vmatpush1.bf16.msra.mxu1 %v3738_v53  ;;  %v3805_v52 = vld [vmem:[#allocation10 + $0x78] sm:$0xff]  }
 0x201   :  { %2401 = vmatprep.subr.bf16.mxu0 %v3743_v54  ;;  %2565 = vmatprep.subr.bf16.mxu1 %v3746_v55  ;;  %v3806_v53 = vld [vmem:[#allocation10 + $0xf8] sm:$0xff]  }
 0x202   :  { %v3807_v54 = vld [vmem:[#allocation10 + $0x38] sm:$0xff]  }
 0x203   :  { %v3808_v55 = vld [vmem:[#allocation10 + $0xb8] sm:$0xff]  }
 0x204   :  { %2402 = vmatpush1.bf16.msra.mxu0 %v3741_v56  ;;  %2566 = vmatpush1.bf16.msra.mxu1 %v3744_v57  ;;  %v956_v56 = vld [vmem:[%s4145_s4] sm:$0xf] }
 0x205   :  { %2403 = vmatprep.subr.bf16.mxu0 %v3749_v58  ;;  %2567 = vmatprep.subr.bf16.mxu1 %v3752_v60  ;;  %v961_v57 = vrot.slane %v956_v56, %v162_v9  ;;  %v969_v58 = vrot.slane %v956_v56, %v170_v30  ;;  %v965_v60 = vrot.slane %v956_v56, %v166_v11 }
 0x208   :  { %2404 = vmatpush1.bf16.msra.mxu0 %v3747_v61  ;;  %2568 = vmatpush1.bf16.msra.mxu1 %v3750_v62  ;;  %v973_v61 = vrot.slane %v956_v56, %v174_v15 }
 0x209   :  { %2405 = vmatprep.subr.bf16.mxu0 %v3755_v63  ;;  %2569 = vmatprep.subr.bf16.mxu1 %v3758_v1 }
 0x20c   :  { %2406 = vmatpush1.bf16.msra.mxu0 %v3753_v2  ;;  %2570 = vmatpush1.bf16.msra.mxu1 %v3756_v3 }
 0x20d   :  { %2407 = vmatprep.subr.bf16.mxu0 %v3761_v5  ;;  %2571 = vmatprep.subr.bf16.mxu1 %v3764_v12 }
 0x210   :  { %2408 = vmatpush1.bf16.msra.mxu0 %v3759_v13  ;;  %2572 = vmatpush1.bf16.msra.mxu1 %v3762_v59 }
 0x211   :  { %2409 = vmatprep.subr.bf16.mxu0 %v3767_v17  ;;  %2573 = vmatprep.subr.bf16.mxu1 %v3770_v18 }
 0x214   :  { %2410 = vmatpush1.bf16.msra.mxu0 %v3765_v19  ;;  %2574 = vmatpush1.bf16.msra.mxu1 %v3768_v20 }
 0x215   :  { %2411 = vmatprep.subr.bf16.mxu0 %v3773_v21  ;;  %2575 = vmatprep.subr.bf16.mxu1 %v3776_v22  ;;  %v3275_v22 = vld [vmem:[%s4147_s6] ss:$0 sm:$0xff] }
 0x218   :  { %2412 = vmatpush1.bf16.msra.mxu0 %v3771_v23  ;;  %2576 = vmatpush1.bf16.msra.mxu1 %v3774_v24 }
 0x219   :  { %3308 = vmatprep.subr.bf16.mxu0 %v3777_v10  ;;  %3330 = vmatprep.subr.bf16.mxu1 %v3778_v25 }
 0x21b   :  { %2414 = vmatmul.mubr.bf16.vlgmr.msra.gmra.mrb[8].mxu0 %v698_v29  ;;  %2578 = vmatmul.mubr.bf16.vlgmr.msra.gmra.mrb[8].mxu1 %v698_v29 }
 0x21c   :  { %3309 = vmatpush3.bf16.msra.mxu0 %v3779_v27  ;;  %3331 = vmatpush3.bf16.msra.mxu1 %v3780_v28 }
 0x21d   :  { %3310 = vmatprep.subr.bf16.mxu0 %v3781_v7  ;;  %3332 = vmatprep.subr.bf16.mxu1 %v3782_v31 }
 0x220   :  { %3311 = vmatpush3.bf16.msra.mxu0 %v3783_v32  ;;  %3333 = vmatpush3.bf16.msra.mxu1 %v3784_v33 }
 0x221   :  { %3312 = vmatprep.subr.bf16.mxu0 %v3785_v34  ;;  %3334 = vmatprep.subr.bf16.mxu1 %v3786_v35 }
 0x224   :  { %3313 = vmatpush3.bf16.msra.mxu0 %v3787_v36  ;;  %3335 = vmatpush3.bf16.msra.mxu1 %v3788_v37 }
 0x225   :  { %3314 = vmatprep.subr.bf16.mxu0 %v3789_v38  ;;  %3336 = vmatprep.subr.bf16.mxu1 %v3790_v39 }
 0x228   :  { %3315 = vmatpush3.bf16.msra.mxu0 %v3791_v40  ;;  %3337 = vmatpush3.bf16.msra.mxu1 %v3792_v41 }
 0x229   :  { %3316 = vmatprep.subr.bf16.mxu0 %v3793_v42  ;;  %3338 = vmatprep.subr.bf16.mxu1 %v3794_v0 }
 0x22c   :  { %3317 = vmatpush3.bf16.msra.mxu0 %v3795_v43  ;;  %3339 = vmatpush3.bf16.msra.mxu1 %v3796_v44 }
 0x22d   :  { %3318 = vmatprep.subr.bf16.mxu0 %v3797_v45  ;;  %3340 = vmatprep.subr.bf16.mxu1 %v3798_v46 }
 0x230   :  { %3319 = vmatpush3.bf16.msra.mxu0 %v3799_v47  ;;  %3341 = vmatpush3.bf16.msra.mxu1 %v3800_v48 }
 0x231   :  { %3320 = vmatprep.subr.bf16.mxu0 %v3801_v49  ;;  %3342 = vmatprep.subr.bf16.mxu1 %v3802_v50 }
 0x234   :  { %3321 = vmatpush3.bf16.msra.mxu0 %v3803_v51  ;;  %3343 = vmatpush3.bf16.msra.mxu1 %v3804_v26 }
 0x235   :  { %3322 = vmatprep.subr.bf16.mxu0 %v3805_v52  ;;  %3344 = vmatprep.subr.bf16.mxu1 %v3806_v53 }
 0x238   :  { %3323 = vmatpush3.bf16.msra.mxu0 %v3807_v54  ;;  %3345 = vmatpush3.bf16.msra.mxu1 %v3808_v55 }
 0x2ee   :  { %v2415_v62 = vpop.f32.mrb[8].mxu0  ;;  %v2579_v63 = vpop.f32.mrb[8].mxu1 }
 0x2ef   :  { %v3352_v1 = vadd.f32 %v2415_v62, %v961_v57  ;;  %v3354_v2 = vadd.f32 %v2579_v63, %v969_v58  ;;  %v2417_v3 = vpop.f32.mrb[9].mxu0  ;;  %v2581_v4 = vpop.f32.mrb[9].mxu1 }
 0x2f0   :  { %v3353_v5 = vadd.f32 %v2417_v3, %v965_v60  ;;  %v3355_v12 = vadd.f32 %v2581_v4, %v973_v61  ;;  %v2419_v13 = vpop.f32.mrb[10].mxu0  ;;  %v2583_v59 = vpop.f32.mrb[10].mxu1 }
 0x2f1   :  { %v2586_v9 = vmax.f32 %v3352_v1, 0.0  ;;  %v2588_v16 = vmax.f32 %v3354_v2, 0.0  ;;  %v2420_v17 = vpop.f32.mrb[11].mxu0  ;;  %v2584_v30 = vpop.f32.mrb[11].mxu1 }
 0x2f2   :  { %v2587_v18 = vmax.f32 %v3353_v5, 0.0  ;;  %v2589_v19 = vmax.f32 %v3355_v12, 0.0 }
 0x2f3   :  { %v2590_v8 = vpack.c.bf16 %v2586_v9, %v2586_v9  ;;  %v2592_v15 = vpack.c.bf16 %v2588_v16, %v2588_v16 }
 0x2f4   :  { %v2591_v11 = vpack.c.bf16 %v2587_v18, %v2587_v18  ;;  %v2593_v20 = vpack.c.bf16 %v2589_v19, %v2589_v19 }
 0x2f6   :  { %2889 = vmatprep.mubr.bf16.mxu0 %v2591_v11  ;;  %2929 = vmatprep.mubr.bf16.mxu1 %v2593_v20 }
 0x2f7   :  { %2890 = vmatmul.mubr.bf16.vlgmr.msra.gmra.mrb[12].mxu0 %v2590_v8  ;;  %2930 = vmatmul.mubr.bf16.vlgmr.msra.gmra.mrb[12].mxu1 %v2592_v15 }
 0x3ca   :  { %v3324_v14 = vpop.f32.mrb[12].mxu0  ;;  %v3346_v21 = vpop.f32.mrb[12].mxu1 }
 0x3cb   :  { %v3325_v23 = vpop.f32.mrb[13].mxu0  ;;  %v3347_v24 = vpop.f32.mrb[13].mxu1 }
 0x3cc   :  { %v3326_v6 = vadd.f32 %v3325_v23, %v3324_v14  ;;  %v3348_v10 = vadd.f32 %v3347_v24, %v3346_v21  ;;  %v3327_v25 = vpop.f32.mrb[14].mxu0  ;;  %v3349_v27 = vpop.f32.mrb[14].mxu1 }
 0x3cd   :  { %v3328_v28 = vpop.f32.mrb[15].mxu0  ;;  %v3350_v29 = vpop.f32.mrb[15].mxu1 }
 0x3ce   :  { %v2892_v7 = vadd.f32 %v3326_v6, %v3275_v22 }
 0x3d0   :  { %v2932_v31 = vadd.f32 %v3348_v10, %v2892_v7 }
 0x3d2   :  { %2937 = vst [vmem:[#allocation11] sm:$0xff] %v2932_v31 }
 0x3d3   :  { %3930 = shalt.err (!%p3927_p2)
}
 0x3d4   :  { %s3931_s21 = scalar_lea.hbm %s4148_s7, 128 }
 0x3d5   :  { %p3932_p3 = scmp.ne.s32.totalorder %s4148_s7, %s3931_s21  ;;  %p3935_p4 = scmp.lt.u32.totalorder %s3931_s21, %s4148_s7 }
 0x3d7   :  { %p3937_p5 = pnand %p3935_p4, %p3932_p3 }
 0x3d9   :  { %3940 = shalt.err (!%p3937_p5)
}
 0x3da   :  { %2947 = dma.vmem_to_hbm [thread:$0]  %s2945_s18, 128, %s4148_s7, [#allocation4]  }
 0x3db   :  { %3947 = dma.done.wait [#allocation4], 128  }
 0x3dc   :  { %3948 = vsyncadd [#allocation4], 4294967168 }
 0x3dd   :  { %2951 = vsyncpa [#allocation3], 1 }
 0x3de   :  { %2952 = vsyncpa [#allocation6], 1 }
 0x3df   :  { %2953 = vsyncpa [#allocation9], 1 }
 0x3e0   :  { %2954 = vsyncpa [#allocation4], 1 }

</bundles_post_ra>
